<compile_context>
chip_gen: v5e
topology: v5e:2x2
jax: 0.10.0
libtpu: 0.0.40
codegen_flags: <defaults>
</compile_context>

<pallas_src>
import math
import functools

import jax
import jax.numpy as jnp
from jax.experimental import pallas as pl
from jax.experimental.pallas import tpu as pltpu

# ----------------------- model hyper-parameters (small) ----------------------
VOCAB = 100      # tokenizer.vocab_size
H     = 32       # hidden_size
NH    = 2        # attention heads
DH    = H // NH  # head dim
FF    = 64       # intermediate size
NLAYERS = 2
OUT_DIM = 8      # args.out_dim
MAX_POS = 16
LN_EPS  = 1e-5
NEG_INF = -1e9


# ------------------------------ in-kernel helpers -----------------------------
def _layernorm(x, g, b):
    mu = jnp.mean(x, axis=-1, keepdims=True)
    var = jnp.mean((x - mu) ** 2, axis=-1, keepdims=True)
    return (x - mu) * jax.lax.rsqrt(var + LN_EPS) * g + b


# ------------------------------ fused Pallas kernel ---------------------------
def _fused_encoder_kernel(
        # resident-across-layers inputs
        emb_ref, mask_ref, emb_g_ref, emb_b_ref,
        # per-layer (stacked, layer axis squeezed by BlockSpec) weights
        wqkv_ref, bqkv_ref, wo_ref, bo_ref,
        ln1_g_ref, ln1_b_ref,
        w1_ref, b1_ref, w2_ref, b2_ref,
        ln2_g_ref, ln2_b_ref,
        # epilogue weights
        outw_ref, outb_ref,
        # output
        o_ref,
        # VMEM-resident activation slab
        x_scratch,
        *, batch, seq):
    l = pl.program_id(0)
    scale = 1.0 / math.sqrt(DH)

    # -------- prologue (layer 0 only): embedding LayerNorm --------
    @pl.when(l == 0)
    def _():
        x_scratch[...] = _layernorm(emb_ref[...], emb_g_ref[...], emb_b_ref[...])

    x = x_scratch[...]                                           # [B*S, H]

    # -------- self-attention with fused QKV projection --------
    qkv = jnp.dot(x, wqkv_ref[...], preferred_element_type=jnp.float32)
    qkv = qkv + bqkv_ref[...]                                    # [B*S, 3H]
    q = qkv[:, 0:H] * scale
    k = qkv[:, H:2 * H]
    v = qkv[:, 2 * H:3 * H]

    # One [BS,BS] score matmul per head (heads = static lane slices); the
    # additive mask enforces both the batch block-diagonal and key padding.
    ctx_heads = []
    for h in range(NH):
        c0 = h * DH
        qh = q[:, c0:c0 + DH]                                    # [BS, DH]
        kh = k[:, c0:c0 + DH]
        vh = v[:, c0:c0 + DH]
        s = jax.lax.dot_general(qh, kh, (((1,), (1,)), ((), ())),
                                preferred_element_type=jnp.float32)
        s = s + mask_ref[...]                                    # [BS, BS]
        s = s - jnp.max(s, axis=-1, keepdims=True)
        p = jnp.exp(s)
        denom = jnp.sum(p, axis=-1, keepdims=True)
        p = p * pl.reciprocal(denom, approx=True)                # EUP divide
        ctx_heads.append(jnp.dot(p, vh, preferred_element_type=jnp.float32))
    ctx = jnp.concatenate(ctx_heads, axis=-1)                    # [BS, H]

    attn_out = jnp.dot(ctx, wo_ref[...], preferred_element_type=jnp.float32)
    attn_out = attn_out + bo_ref[...]
    x = _layernorm(x + attn_out, ln1_g_ref[...], ln1_b_ref[...])  # post-LN

    # -------- feed-forward --------
    ff = jnp.dot(x, w1_ref[...], preferred_element_type=jnp.float32) + b1_ref[...]
    # TODO(synk): HF RoBERTa uses exact (erf) GELU; tanh approximation used
    # here for robust Mosaic lowering.
    ff = jax.nn.gelu(ff, approximate=True)
    ff = jnp.dot(ff, w2_ref[...], preferred_element_type=jnp.float32) + b2_ref[...]
    x = _layernorm(x + ff, ln2_g_ref[...], ln2_b_ref[...])

    x_scratch[...] = x

    # -------- epilogue (last layer only): CLS pooling + output Linear --------
    @pl.when(l == pl.num_programs(0) - 1)
    def _():
        bs = batch * seq
        col = jax.lax.broadcasted_iota(jnp.int32, (batch, bs), 1)
        tgt = jax.lax.broadcasted_iota(jnp.int32, (batch, bs), 0) * seq
        sel = (col == tgt).astype(jnp.float32)                   # one-hot CLS rows
        cls = jnp.dot(sel, x, preferred_element_type=jnp.float32)       # [B, H]
        out = jnp.dot(cls, outw_ref[...], preferred_element_type=jnp.float32)
        o_ref[...] = out + outb_ref[...]                         # [B, OUT_DIM]


# ------------------------------ parameters ------------------------------------
def init_params(key):
    def nrm(k, shape):
        return jax.random.normal(k, shape, jnp.float32) * 0.02

    keys = jax.random.split(key, 8)
    return {
        "word_emb": nrm(keys[0], (VOCAB, H)),
        "pos_emb":  nrm(keys[1], (MAX_POS, H)),
        "type_emb": nrm(keys[2], (2, H)),
        "emb_ln_g": jnp.ones((1, H), jnp.float32),
        "emb_ln_b": jnp.zeros((1, H), jnp.float32),
        # per-layer weights stacked along a leading NLAYERS axis
        "wqkv": nrm(keys[3], (NLAYERS, H, 3 * H)),
        "bqkv": jnp.zeros((NLAYERS, 1, 3 * H), jnp.float32),
        "wo":   nrm(keys[4], (NLAYERS, H, H)),
        "bo":   jnp.zeros((NLAYERS, 1, H), jnp.float32),
        "ln1_g": jnp.ones((NLAYERS, 1, H), jnp.float32),
        "ln1_b": jnp.zeros((NLAYERS, 1, H), jnp.float32),
        "w1":   nrm(keys[5], (NLAYERS, H, FF)),
        "b1":   jnp.zeros((NLAYERS, 1, FF), jnp.float32),
        "w2":   nrm(keys[6], (NLAYERS, FF, H)),
        "b2":   jnp.zeros((NLAYERS, 1, H), jnp.float32),
        "ln2_g": jnp.ones((NLAYERS, 1, H), jnp.float32),
        "ln2_b": jnp.zeros((NLAYERS, 1, H), jnp.float32),
        "out_w": nrm(keys[7], (H, OUT_DIM)),
        "out_b": jnp.zeros((1, OUT_DIM), jnp.float32),
    }


# ------------------------------ forward (one pallas_call) ---------------------
def model_forward(params, input_ids, input_attn):
    """Equivalent of Model.forward(input_ids, input_attn) -> [B, OUT_DIM]."""
    B, S = input_ids.shape
    BS = B * S

    # Embedding_ : integer-id path (embedding lookup). Gather stays in glue.
    word = params["word_emb"][input_ids]                         # [B, S, H]
    pos = params["pos_emb"][jnp.arange(S)][None, :, :]           # [1, S, H]
    tok = params["type_emb"][0][None, None, :]                   # [1, 1, H]
    emb = (word + pos + tok).reshape(BS, H)

    # Combined additive attention mask over the flattened [B*S, B*S] score
    # matrix: 0 where (same batch AND key not padding), -1e9 elsewhere.
    batch_ids = jnp.repeat(jnp.arange(B), S)                     # [B*S]
    same_batch = batch_ids[:, None] == batch_ids[None, :]
    key_valid = (input_attn.reshape(BS) > 0)[None, :]
    add_mask = jnp.where(same_batch & key_valid, 0.0, NEG_INF).astype(jnp.float32)

    kernel = functools.partial(_fused_encoder_kernel, batch=B, seq=S)

    grid_spec = pltpu.PrefetchScalarGridSpec(
        num_scalar_prefetch=0,
        grid=(NLAYERS,),
        in_specs=[
            pl.BlockSpec((BS, H), lambda l: (0, 0)),               # emb
            pl.BlockSpec((BS, BS), lambda l: (0, 0)),              # add_mask
            pl.BlockSpec((1, H), lambda l: (0, 0)),                # emb ln gamma
            pl.BlockSpec((1, H), lambda l: (0, 0)),                # emb ln beta
            pl.BlockSpec((None, H, 3 * H), lambda l: (l, 0, 0)),   # wqkv
            pl.BlockSpec((None, 1, 3 * H), lambda l: (l, 0, 0)),   # bqkv
            pl.BlockSpec((None, H, H), lambda l: (l, 0, 0)),       # wo
            pl.BlockSpec((None, 1, H), lambda l: (l, 0, 0)),       # bo
            pl.BlockSpec((None, 1, H), lambda l: (l, 0, 0)),       # ln1 gamma
            pl.BlockSpec((None, 1, H), lambda l: (l, 0, 0)),       # ln1 beta
            pl.BlockSpec((None, H, FF), lambda l: (l, 0, 0)),      # w1
            pl.BlockSpec((None, 1, FF), lambda l: (l, 0, 0)),      # b1
            pl.BlockSpec((None, FF, H), lambda l: (l, 0, 0)),      # w2
            pl.BlockSpec((None, 1, H), lambda l: (l, 0, 0)),       # b2
            pl.BlockSpec((None, 1, H), lambda l: (l, 0, 0)),       # ln2 gamma
            pl.BlockSpec((None, 1, H), lambda l: (l, 0, 0)),       # ln2 beta
            pl.BlockSpec((H, OUT_DIM), lambda l: (0, 0)),          # out_w
            pl.BlockSpec((1, OUT_DIM), lambda l: (0, 0)),          # out_b
        ],
        out_specs=pl.BlockSpec((B, OUT_DIM), lambda l: (0, 0)),
        scratch_shapes=[pltpu.VMEM((BS, H), jnp.float32)],         # resident acts
    )

    return pl.pallas_call(
        kernel,
        out_shape=jax.ShapeDtypeStruct((B, OUT_DIM), jnp.float32),
        grid_spec=grid_spec,
        compiler_params=pltpu.CompilerParams(
            dimension_semantics=("arbitrary",)),                   # sequential layers
    )(emb, add_mask,
      params["emb_ln_g"], params["emb_ln_b"],
      params["wqkv"], params["bqkv"], params["wo"], params["bo"],
      params["ln1_g"], params["ln1_b"],
      params["w1"], params["b1"], params["w2"], params["b2"],
      params["ln2_g"], params["ln2_b"],
      params["out_w"], params["out_b"])


if __name__ == "__main__":
    key = jax.random.PRNGKey(0)
    pkey, ikey = jax.random.split(key)
    params = init_params(pkey)

    B, S = 2, 8
    input_ids = jax.random.randint(ikey, (B, S), 0, VOCAB, dtype=jnp.int32)
    # second example has two padding positions at the end
    input_attn = jnp.array([[1, 1, 1, 1, 1, 1, 1, 1],
                            [1, 1, 1, 1, 1, 1, 0, 0]], dtype=jnp.int32)

    out = model_forward(params, input_ids, input_attn)
    jax.block_until_ready(out)
    assert out.shape == (B, OUT_DIM)
    print("KERNEL_OK")
</pallas_src>

<mosaic_0001>
module attributes {stable_mosaic.version = 11 : i64} {
  func.func @_fused_encoder_kernel(%arg0: i32, %arg1: memref<16x32xf32, #tpu.memory_space<vmem>>, %arg2: memref<16x16xf32, #tpu.memory_space<vmem>>, %arg3: memref<1x32xf32, #tpu.memory_space<vmem>>, %arg4: memref<1x32xf32, #tpu.memory_space<vmem>>, %arg5: memref<1x32x96xf32, #tpu.memory_space<vmem>>, %arg6: memref<1x1x96xf32, #tpu.memory_space<vmem>>, %arg7: memref<1x32x32xf32, #tpu.memory_space<vmem>>, %arg8: memref<1x1x32xf32, #tpu.memory_space<vmem>>, %arg9: memref<1x1x32xf32, #tpu.memory_space<vmem>>, %arg10: memref<1x1x32xf32, #tpu.memory_space<vmem>>, %arg11: memref<1x32x64xf32, #tpu.memory_space<vmem>>, %arg12: memref<1x1x64xf32, #tpu.memory_space<vmem>>, %arg13: memref<1x64x32xf32, #tpu.memory_space<vmem>>, %arg14: memref<1x1x32xf32, #tpu.memory_space<vmem>>, %arg15: memref<1x1x32xf32, #tpu.memory_space<vmem>>, %arg16: memref<1x1x32xf32, #tpu.memory_space<vmem>>, %arg17: memref<32x8xf32, #tpu.memory_space<vmem>>, %arg18: memref<1x8xf32, #tpu.memory_space<vmem>>, %arg19: memref<2x8xf32, #tpu.memory_space<vmem>>, %arg20: memref<16x32xf32, #tpu.memory_space<vmem>>) attributes {dimension_semantics = [#tpu.dimension_semantics<arbitrary>], iteration_bounds = array<i64: 2>, scalar_prefetch = 0 : i64, scratch_operands = 1 : i64, tpu.core_type = #tpu.core_type<tc>, window_params = [{pipeline_mode = #tpu.pipeline_mode<synchronous>, transform_indices = @transform_0, window_bounds = array<i64: 16, 32>}, {pipeline_mode = #tpu.pipeline_mode<synchronous>, transform_indices = @transform_1, window_bounds = array<i64: 16, 16>}, {pipeline_mode = #tpu.pipeline_mode<synchronous>, transform_indices = @transform_2, window_bounds = array<i64: 1, 32>}, {pipeline_mode = #tpu.pipeline_mode<synchronous>, transform_indices = @transform_3, window_bounds = array<i64: 1, 32>}, {transform_indices = @transform_4, window_bounds = array<i64: 1, 32, 96>}, {transform_indices = @transform_5, window_bounds = array<i64: 1, 1, 96>}, {transform_indices = @transform_6, window_bounds = array<i64: 1, 32, 32>}, {transform_indices = @transform_7, window_bounds = array<i64: 1, 1, 32>}, {transform_indices = @transform_8, window_bounds = array<i64: 1, 1, 32>}, {transform_indices = @transform_9, window_bounds = array<i64: 1, 1, 32>}, {transform_indices = @transform_10, window_bounds = array<i64: 1, 32, 64>}, {transform_indices = @transform_11, window_bounds = array<i64: 1, 1, 64>}, {transform_indices = @transform_12, window_bounds = array<i64: 1, 64, 32>}, {transform_indices = @transform_13, window_bounds = array<i64: 1, 1, 32>}, {transform_indices = @transform_14, window_bounds = array<i64: 1, 1, 32>}, {transform_indices = @transform_15, window_bounds = array<i64: 1, 1, 32>}, {pipeline_mode = #tpu.pipeline_mode<synchronous>, transform_indices = @transform_16, window_bounds = array<i64: 32, 8>}, {pipeline_mode = #tpu.pipeline_mode<synchronous>, transform_indices = @transform_17, window_bounds = array<i64: 1, 8>}, {pipeline_mode = #tpu.pipeline_mode<synchronous>, transform_indices = @transform_18, window_bounds = array<i64: 2, 8>}]} {
    %c0_i32 = arith.constant 0 : i32
    %0 = arith.cmpi eq, %arg0, %c0_i32 : i32
    %1 = arith.extui %0 : i1 to i32
    %c0_i32_0 = arith.constant 0 : i32
    %2 = arith.cmpi ne, %1, %c0_i32_0 : i32
    scf.if %2 {
      %c0_71 = arith.constant 0 : index
      %c0_72 = arith.constant 0 : index
      %143 = vector.load %arg1[%c0_71, %c0_72] : memref<16x32xf32, #tpu.memory_space<vmem>>, vector<16x32xf32>
      %c0_73 = arith.constant 0 : index
      %c0_74 = arith.constant 0 : index
      %144 = vector.load %arg3[%c0_73, %c0_74] : memref<1x32xf32, #tpu.memory_space<vmem>>, vector<1x32xf32>
      %c0_75 = arith.constant 0 : index
      %c0_76 = arith.constant 0 : index
      %145 = vector.load %arg4[%c0_75, %c0_76] : memref<1x32xf32, #tpu.memory_space<vmem>>, vector<1x32xf32>
      %cst_77 = arith.constant dense<0.000000e+00> : vector<16xf32>
      %146 = vector.multi_reduction <add>, %143, %cst_77 [1] : vector<16x32xf32> to vector<16xf32>
      %147 = vector.shape_cast %146 : vector<16xf32> to vector<16x1xf32>
      %cst_78 = arith.constant 3.200000e+01 : f32
      %148 = vector.broadcast %cst_78 : f32 to vector<16x1xf32>
      %149 = arith.divf %147, %148 : vector<16x1xf32>
      %150 = vector.broadcast %149 : vector<16x1xf32> to vector<16x32xf32>
      %151 = arith.subf %143, %150 : vector<16x32xf32>
      %152 = arith.mulf %151, %151 : vector<16x32xf32>
      %cst_79 = arith.constant dense<0.000000e+00> : vector<16xf32>
      %153 = vector.multi_reduction <add>, %152, %cst_79 [1] : vector<16x32xf32> to vector<16xf32>
      %154 = vector.shape_cast %153 : vector<16xf32> to vector<16x1xf32>
      %cst_80 = arith.constant 3.200000e+01 : f32
      %155 = vector.broadcast %cst_80 : f32 to vector<16x1xf32>
      %156 = arith.divf %154, %155 : vector<16x1xf32>
      %157 = vector.broadcast %149 : vector<16x1xf32> to vector<16x32xf32>
      %158 = arith.subf %143, %157 : vector<16x32xf32>
      %cst_81 = arith.constant 9.99999974E-6 : f32
      %159 = vector.broadcast %cst_81 : f32 to vector<16x1xf32>
      %160 = arith.addf %156, %159 : vector<16x1xf32>
      %161 = math.rsqrt %160 : vector<16x1xf32>
      %162 = vector.broadcast %161 : vector<16x1xf32> to vector<16x32xf32>
      %163 = arith.mulf %158, %162 : vector<16x32xf32>
      %164 = vector.broadcast %144 : vector<1x32xf32> to vector<16x32xf32>
      %165 = arith.mulf %163, %164 : vector<16x32xf32>
      %166 = vector.broadcast %145 : vector<1x32xf32> to vector<16x32xf32>
      %167 = arith.addf %165, %166 : vector<16x32xf32>
      %c0_82 = arith.constant 0 : index
      %c0_83 = arith.constant 0 : index
      %168 = vector.load %arg20[%c0_82, %c0_83] : memref<16x32xf32, #tpu.memory_space<vmem>>, vector<16x32xf32>
      tpu.vector_store %arg20[%c0_82, %c0_83], %167 {strides = array<i32>} : memref<16x32xf32, #tpu.memory_space<vmem>>, vector<16x32xf32>,
    } else {
    }
    %c0 = arith.constant 0 : index
    %c0_1 = arith.constant 0 : index
    %3 = vector.load %arg20[%c0, %c0_1] : memref<16x32xf32, #tpu.memory_space<vmem>>, vector<16x32xf32>
    %c0_2 = arith.constant 0 : index
    %c0_3 = arith.constant 0 : index
    %c0_4 = arith.constant 0 : index
    %4 = vector.load %arg5[%c0_2, %c0_3, %c0_4] : memref<1x32x96xf32, #tpu.memory_space<vmem>>, vector<1x32x96xf32>
    %5 = vector.shape_cast %4 : vector<1x32x96xf32> to vector<32x96xf32>
    %cst = arith.constant dense<0.000000e+00> : vector<16x96xf32>
    %6 = tpu.matmul %3, %5, %cst {dimension_numbers = #tpu.dot_dimension_numbers<[1], [0], [0], [1], [0, 0, 1, 1], [], []>} : vector<16x32xf32>, vector<32x96xf32>, vector<16x96xf32> -> vector<16x96xf32>
    %c0_5 = arith.constant 0 : index
    %c0_6 = arith.constant 0 : index
    %c0_7 = arith.constant 0 : index
    %7 = vector.load %arg6[%c0_5, %c0_6, %c0_7] : memref<1x1x96xf32, #tpu.memory_space<vmem>>, vector<1x1x96xf32>
    %8 = vector.shape_cast %7 : vector<1x1x96xf32> to vector<1x96xf32>
    %9 = vector.broadcast %8 : vector<1x96xf32> to vector<16x96xf32>
    %10 = arith.addf %6, %9 : vector<16x96xf32>
    %11 = vector.extract_strided_slice %10 {offsets = [0, 0], sizes = [16, 32], strides = [1, 1]} : vector<16x96xf32> to vector<16x32xf32>
    %cst_8 = arith.constant 2.500000e-01 : f32
    %12 = vector.broadcast %cst_8 : f32 to vector<16x32xf32>
    %13 = arith.mulf %11, %12 : vector<16x32xf32>
    %14 = vector.extract_strided_slice %10 {offsets = [0, 32], sizes = [16, 32], strides = [1, 1]} : vector<16x96xf32> to vector<16x32xf32>
    %15 = vector.extract_strided_slice %10 {offsets = [0, 64], sizes = [16, 32], strides = [1, 1]} : vector<16x96xf32> to vector<16x32xf32>
    %16 = vector.extract_strided_slice %13 {offsets = [0, 0], sizes = [16, 16], strides = [1, 1]} : vector<16x32xf32> to vector<16x16xf32>
    %17 = vector.extract_strided_slice %14 {offsets = [0, 0], sizes = [16, 16], strides = [1, 1]} : vector<16x32xf32> to vector<16x16xf32>
    %18 = vector.extract_strided_slice %15 {offsets = [0, 0], sizes = [16, 16], strides = [1, 1]} : vector<16x32xf32> to vector<16x16xf32>
    %cst_9 = arith.constant dense<0.000000e+00> : vector<16x16xf32>
    %19 = tpu.matmul %16, %17, %cst_9 {dimension_numbers = #tpu.dot_dimension_numbers<[1], [1], [0], [0], [0, 0, 1, 0], [], []>} : vector<16x16xf32>, vector<16x16xf32>, vector<16x16xf32> -> vector<16x16xf32>
    %c0_10 = arith.constant 0 : index
    %c0_11 = arith.constant 0 : index
    %20 = vector.load %arg2[%c0_10, %c0_11] : memref<16x16xf32, #tpu.memory_space<vmem>>, vector<16x16xf32>
    %21 = arith.addf %19, %20 : vector<16x16xf32>
    %cst_12 = arith.constant dense<0xFF800000> : vector<16xf32>
    %22 = vector.multi_reduction <maximumf>, %21, %cst_12 [1] : vector<16x16xf32> to vector<16xf32>
    %23 = vector.shape_cast %22 : vector<16xf32> to vector<16x1xf32>
    %24 = vector.broadcast %23 : vector<16x1xf32> to vector<16x16xf32>
    %25 = arith.subf %21, %24 : vector<16x16xf32>
    %26 = math.exp %25 : vector<16x16xf32>
    %cst_13 = arith.constant dense<0.000000e+00> : vector<16xf32>
    %27 = vector.multi_reduction <add>, %26, %cst_13 [1] : vector<16x16xf32> to vector<16xf32>
    %28 = vector.shape_cast %27 : vector<16xf32> to vector<16x1xf32>
    %29 = tpu.reciprocal %28 {approx = true} : vector<16x1xf32> -> vector<16x1xf32>
    %30 = vector.broadcast %29 : vector<16x1xf32> to vector<16x16xf32>
    %31 = arith.mulf %26, %30 : vector<16x16xf32>
    %cst_14 = arith.constant dense<0.000000e+00> : vector<16x16xf32>
    %32 = tpu.matmul %31, %18, %cst_14 {dimension_numbers = #tpu.dot_dimension_numbers<[1], [0], [0], [1], [0, 0, 1, 1], [], []>} : vector<16x16xf32>, vector<16x16xf32>, vector<16x16xf32> -> vector<16x16xf32>
    %33 = vector.extract_strided_slice %13 {offsets = [0, 16], sizes = [16, 16], strides = [1, 1]} : vector<16x32xf32> to vector<16x16xf32>
    %34 = vector.extract_strided_slice %14 {offsets = [0, 16], sizes = [16, 16], strides = [1, 1]} : vector<16x32xf32> to vector<16x16xf32>
    %35 = vector.extract_strided_slice %15 {offsets = [0, 16], sizes = [16, 16], strides = [1, 1]} : vector<16x32xf32> to vector<16x16xf32>
    %cst_15 = arith.constant dense<0.000000e+00> : vector<16x16xf32>
    %36 = tpu.matmul %33, %34, %cst_15 {dimension_numbers = #tpu.dot_dimension_numbers<[1], [1], [0], [0], [0, 0, 1, 0], [], []>} : vector<16x16xf32>, vector<16x16xf32>, vector<16x16xf32> -> vector<16x16xf32>
    %c0_16 = arith.constant 0 : index
    %c0_17 = arith.constant 0 : index
    %37 = vector.load %arg2[%c0_16, %c0_17] : memref<16x16xf32, #tpu.memory_space<vmem>>, vector<16x16xf32>
    %38 = arith.addf %36, %37 : vector<16x16xf32>
    %cst_18 = arith.constant dense<0xFF800000> : vector<16xf32>
    %39 = vector.multi_reduction <maximumf>, %38, %cst_18 [1] : vector<16x16xf32> to vector<16xf32>
    %40 = vector.shape_cast %39 : vector<16xf32> to vector<16x1xf32>
    %41 = vector.broadcast %40 : vector<16x1xf32> to vector<16x16xf32>
    %42 = arith.subf %38, %41 : vector<16x16xf32>
    %43 = math.exp %42 : vector<16x16xf32>
    %cst_19 = arith.constant dense<0.000000e+00> : vector<16xf32>
    %44 = vector.multi_reduction <add>, %43, %cst_19 [1] : vector<16x16xf32> to vector<16xf32>
    %45 = vector.shape_cast %44 : vector<16xf32> to vector<16x1xf32>
    %46 = tpu.reciprocal %45 {approx = true} : vector<16x1xf32> -> vector<16x1xf32>
    %47 = vector.broadcast %46 : vector<16x1xf32> to vector<16x16xf32>
    %48 = arith.mulf %43, %47 : vector<16x16xf32>
    %cst_20 = arith.constant dense<0.000000e+00> : vector<16x16xf32>
    %49 = tpu.matmul %48, %35, %cst_20 {dimension_numbers = #tpu.dot_dimension_numbers<[1], [0], [0], [1], [0, 0, 1, 1], [], []>} : vector<16x16xf32>, vector<16x16xf32>, vector<16x16xf32> -> vector<16x16xf32>
    %50 = tpu.concatenate %32, %49 in 1 : vector<16x16xf32>, vector<16x16xf32> -> vector<16x32xf32>
    %c0_21 = arith.constant 0 : index
    %c0_22 = arith.constant 0 : index
    %c0_23 = arith.constant 0 : index
    %51 = vector.load %arg7[%c0_21, %c0_22, %c0_23] : memref<1x32x32xf32, #tpu.memory_space<vmem>>, vector<1x32x32xf32>
    %52 = vector.shape_cast %51 : vector<1x32x32xf32> to vector<32x32xf32>
    %cst_24 = arith.constant dense<0.000000e+00> : vector<16x32xf32>
    %53 = tpu.matmul %50, %52, %cst_24 {dimension_numbers = #tpu.dot_dimension_numbers<[1], [0], [0], [1], [0, 0, 1, 1], [], []>} : vector<16x32xf32>, vector<32x32xf32>, vector<16x32xf32> -> vector<16x32xf32>
    %c0_25 = arith.constant 0 : index
    %c0_26 = arith.constant 0 : index
    %c0_27 = arith.constant 0 : index
    %54 = vector.load %arg8[%c0_25, %c0_26, %c0_27] : memref<1x1x32xf32, #tpu.memory_space<vmem>>, vector<1x1x32xf32>
    %55 = vector.shape_cast %54 : vector<1x1x32xf32> to vector<1x32xf32>
    %56 = vector.broadcast %55 : vector<1x32xf32> to vector<16x32xf32>
    %57 = arith.addf %53, %56 : vector<16x32xf32>
    %58 = arith.addf %3, %57 : vector<16x32xf32>
    %c0_28 = arith.constant 0 : index
    %c0_29 = arith.constant 0 : index
    %c0_30 = arith.constant 0 : index
    %59 = vector.load %arg9[%c0_28, %c0_29, %c0_30] : memref<1x1x32xf32, #tpu.memory_space<vmem>>, vector<1x1x32xf32>
    %60 = vector.shape_cast %59 : vector<1x1x32xf32> to vector<1x32xf32>
    %c0_31 = arith.constant 0 : index
    %c0_32 = arith.constant 0 : index
    %c0_33 = arith.constant 0 : index
    %61 = vector.load %arg10[%c0_31, %c0_32, %c0_33] : memref<1x1x32xf32, #tpu.memory_space<vmem>>, vector<1x1x32xf32>
    %62 = vector.shape_cast %61 : vector<1x1x32xf32> to vector<1x32xf32>
    %cst_34 = arith.constant dense<0.000000e+00> : vector<16xf32>
    %63 = vector.multi_reduction <add>, %58, %cst_34 [1] : vector<16x32xf32> to vector<16xf32>
    %64 = vector.shape_cast %63 : vector<16xf32> to vector<16x1xf32>
    %cst_35 = arith.constant 3.200000e+01 : f32
    %65 = vector.broadcast %cst_35 : f32 to vector<16x1xf32>
    %66 = arith.divf %64, %65 : vector<16x1xf32>
    %67 = vector.broadcast %66 : vector<16x1xf32> to vector<16x32xf32>
    %68 = arith.subf %58, %67 : vector<16x32xf32>
    %69 = arith.mulf %68, %68 : vector<16x32xf32>
    %cst_36 = arith.constant dense<0.000000e+00> : vector<16xf32>
    %70 = vector.multi_reduction <add>, %69, %cst_36 [1] : vector<16x32xf32> to vector<16xf32>
    %71 = vector.shape_cast %70 : vector<16xf32> to vector<16x1xf32>
    %cst_37 = arith.constant 3.200000e+01 : f32
    %72 = vector.broadcast %cst_37 : f32 to vector<16x1xf32>
    %73 = arith.divf %71, %72 : vector<16x1xf32>
    %74 = vector.broadcast %66 : vector<16x1xf32> to vector<16x32xf32>
    %75 = arith.subf %58, %74 : vector<16x32xf32>
    %cst_38 = arith.constant 9.99999974E-6 : f32
    %76 = vector.broadcast %cst_38 : f32 to vector<16x1xf32>
    %77 = arith.addf %73, %76 : vector<16x1xf32>
    %78 = math.rsqrt %77 : vector<16x1xf32>
    %79 = vector.broadcast %78 : vector<16x1xf32> to vector<16x32xf32>
    %80 = arith.mulf %75, %79 : vector<16x32xf32>
    %81 = vector.broadcast %60 : vector<1x32xf32> to vector<16x32xf32>
    %82 = arith.mulf %80, %81 : vector<16x32xf32>
    %83 = vector.broadcast %62 : vector<1x32xf32> to vector<16x32xf32>
    %84 = arith.addf %82, %83 : vector<16x32xf32>
    %c0_39 = arith.constant 0 : index
    %c0_40 = arith.constant 0 : index
    %c0_41 = arith.constant 0 : index
    %85 = vector.load %arg11[%c0_39, %c0_40, %c0_41] : memref<1x32x64xf32, #tpu.memory_space<vmem>>, vector<1x32x64xf32>
    %86 = vector.shape_cast %85 : vector<1x32x64xf32> to vector<32x64xf32>
    %cst_42 = arith.constant dense<0.000000e+00> : vector<16x64xf32>
    %87 = tpu.matmul %84, %86, %cst_42 {dimension_numbers = #tpu.dot_dimension_numbers<[1], [0], [0], [1], [0, 0, 1, 1], [], []>} : vector<16x32xf32>, vector<32x64xf32>, vector<16x64xf32> -> vector<16x64xf32>
    %c0_43 = arith.constant 0 : index
    %c0_44 = arith.constant 0 : index
    %c0_45 = arith.constant 0 : index
    %88 = vector.load %arg12[%c0_43, %c0_44, %c0_45] : memref<1x1x64xf32, #tpu.memory_space<vmem>>, vector<1x1x64xf32>
    %89 = vector.shape_cast %88 : vector<1x1x64xf32> to vector<1x64xf32>
    %90 = vector.broadcast %89 : vector<1x64xf32> to vector<16x64xf32>
    %91 = arith.addf %87, %90 : vector<16x64xf32>
    %92 = arith.mulf %91, %91 : vector<16x64xf32>
    %93 = arith.mulf %91, %92 : vector<16x64xf32>
    %cst_46 = arith.constant 4.471500e-02 : f32
    %94 = vector.broadcast %cst_46 : f32 to vector<16x64xf32>
    %95 = arith.mulf %94, %93 : vector<16x64xf32>
    %96 = arith.addf %91, %95 : vector<16x64xf32>
    %cst_47 = arith.constant 0.797884583 : f32
    %97 = vector.broadcast %cst_47 : f32 to vector<16x64xf32>
    %98 = arith.mulf %97, %96 : vector<16x64xf32>
    %99 = math.tanh %98 : vector<16x64xf32>
    %cst_48 = arith.constant 1.000000e+00 : f32
    %100 = vector.broadcast %cst_48 : f32 to vector<16x64xf32>
    %101 = arith.addf %100, %99 : vector<16x64xf32>
    %cst_49 = arith.constant 5.000000e-01 : f32
    %102 = vector.broadcast %cst_49 : f32 to vector<16x64xf32>
    %103 = arith.mulf %102, %101 : vector<16x64xf32>
    %104 = arith.mulf %91, %103 : vector<16x64xf32>
    %c0_50 = arith.constant 0 : index
    %c0_51 = arith.constant 0 : index
    %c0_52 = arith.constant 0 : index
    %105 = vector.load %arg13[%c0_50, %c0_51, %c0_52] : memref<1x64x32xf32, #tpu.memory_space<vmem>>, vector<1x64x32xf32>
    %106 = vector.shape_cast %105 : vector<1x64x32xf32> to vector<64x32xf32>
    %cst_53 = arith.constant dense<0.000000e+00> : vector<16x32xf32>
    %107 = tpu.matmul %104, %106, %cst_53 {dimension_numbers = #tpu.dot_dimension_numbers<[1], [0], [0], [1], [0, 0, 1, 1], [], []>} : vector<16x64xf32>, vector<64x32xf32>, vector<16x32xf32> -> vector<16x32xf32>
    %c0_54 = arith.constant 0 : index
    %c0_55 = arith.constant 0 : index
    %c0_56 = arith.constant 0 : index
    %108 = vector.load %arg14[%c0_54, %c0_55, %c0_56] : memref<1x1x32xf32, #tpu.memory_space<vmem>>, vector<1x1x32xf32>
    %109 = vector.shape_cast %108 : vector<1x1x32xf32> to vector<1x32xf32>
    %110 = vector.broadcast %109 : vector<1x32xf32> to vector<16x32xf32>
    %111 = arith.addf %107, %110 : vector<16x32xf32>
    %112 = arith.addf %84, %111 : vector<16x32xf32>
    %c0_57 = arith.constant 0 : index
    %c0_58 = arith.constant 0 : index
    %c0_59 = arith.constant 0 : index
    %113 = vector.load %arg15[%c0_57, %c0_58, %c0_59] : memref<1x1x32xf32, #tpu.memory_space<vmem>>, vector<1x1x32xf32>
    %114 = vector.shape_cast %113 : vector<1x1x32xf32> to vector<1x32xf32>
    %c0_60 = arith.constant 0 : index
    %c0_61 = arith.constant 0 : index
    %c0_62 = arith.constant 0 : index
    %115 = vector.load %arg16[%c0_60, %c0_61, %c0_62] : memref<1x1x32xf32, #tpu.memory_space<vmem>>, vector<1x1x32xf32>
    %116 = vector.shape_cast %115 : vector<1x1x32xf32> to vector<1x32xf32>
    %cst_63 = arith.constant dense<0.000000e+00> : vector<16xf32>
    %117 = vector.multi_reduction <add>, %112, %cst_63 [1] : vector<16x32xf32> to vector<16xf32>
    %118 = vector.shape_cast %117 : vector<16xf32> to vector<16x1xf32>
    %cst_64 = arith.constant 3.200000e+01 : f32
    %119 = vector.broadcast %cst_64 : f32 to vector<16x1xf32>
    %120 = arith.divf %118, %119 : vector<16x1xf32>
    %121 = vector.broadcast %120 : vector<16x1xf32> to vector<16x32xf32>
    %122 = arith.subf %112, %121 : vector<16x32xf32>
    %123 = arith.mulf %122, %122 : vector<16x32xf32>
    %cst_65 = arith.constant dense<0.000000e+00> : vector<16xf32>
    %124 = vector.multi_reduction <add>, %123, %cst_65 [1] : vector<16x32xf32> to vector<16xf32>
    %125 = vector.shape_cast %124 : vector<16xf32> to vector<16x1xf32>
    %cst_66 = arith.constant 3.200000e+01 : f32
    %126 = vector.broadcast %cst_66 : f32 to vector<16x1xf32>
    %127 = arith.divf %125, %126 : vector<16x1xf32>
    %128 = vector.broadcast %120 : vector<16x1xf32> to vector<16x32xf32>
    %129 = arith.subf %112, %128 : vector<16x32xf32>
    %cst_67 = arith.constant 9.99999974E-6 : f32
    %130 = vector.broadcast %cst_67 : f32 to vector<16x1xf32>
    %131 = arith.addf %127, %130 : vector<16x1xf32>
    %132 = math.rsqrt %131 : vector<16x1xf32>
    %133 = vector.broadcast %132 : vector<16x1xf32> to vector<16x32xf32>
    %134 = arith.mulf %129, %133 : vector<16x32xf32>
    %135 = vector.broadcast %114 : vector<1x32xf32> to vector<16x32xf32>
    %136 = arith.mulf %134, %135 : vector<16x32xf32>
    %137 = vector.broadcast %116 : vector<1x32xf32> to vector<16x32xf32>
    %138 = arith.addf %136, %137 : vector<16x32xf32>
    %c0_68 = arith.constant 0 : index
    %c0_69 = arith.constant 0 : index
    %139 = vector.load %arg20[%c0_68, %c0_69] : memref<16x32xf32, #tpu.memory_space<vmem>>, vector<16x32xf32>
    tpu.vector_store %arg20[%c0_68, %c0_69], %138 {strides = array<i32>} : memref<16x32xf32, #tpu.memory_space<vmem>>, vector<16x32xf32>,
    %c1_i32 = arith.constant 1 : i32
    %140 = arith.cmpi eq, %arg0, %c1_i32 : i32
    %141 = arith.extui %140 : i1 to i32
    %c0_i32_70 = arith.constant 0 : i32
    %142 = arith.cmpi ne, %141, %c0_i32_70 : i32
    scf.if %142 {
      %143 = tpu.iota {dimensions = array<i32: 1>} : vector<2x16xi32>
      %144 = tpu.iota {dimensions = array<i32: 0>} : vector<2x16xi32>
      %c8_i32 = arith.constant 8 : i32
      %145 = vector.broadcast %c8_i32 : i32 to vector<2x16xi32>
      %146 = arith.muli %144, %145 : vector<2x16xi32>
      %147 = arith.cmpi eq, %143, %146 : vector<2x16xi32>
      %148 = arith.extui %147 : vector<2x16xi1> to vector<2x16xi32>
      %149 = arith.sitofp %148 : vector<2x16xi32> to vector<2x16xf32>
      %cst_71 = arith.constant dense<0.000000e+00> : vector<2x32xf32>
      %150 = tpu.matmul %149, %138, %cst_71 {dimension_numbers = #tpu.dot_dimension_numbers<[1], [0], [0], [1], [0, 0, 1, 1], [], []>} : vector<2x16xf32>, vector<16x32xf32>, vector<2x32xf32> -> vector<2x32xf32>
      %c0_72 = arith.constant 0 : index
      %c0_73 = arith.constant 0 : index
      %151 = vector.load %arg17[%c0_72, %c0_73] : memref<32x8xf32, #tpu.memory_space<vmem>>, vector<32x8xf32>
      %cst_74 = arith.constant dense<0.000000e+00> : vector<2x8xf32>
      %152 = tpu.matmul %150, %151, %cst_74 {dimension_numbers = #tpu.dot_dimension_numbers<[1], [0], [0], [1], [0, 0, 1, 1], [], []>} : vector<2x32xf32>, vector<32x8xf32>, vector<2x8xf32> -> vector<2x8xf32>
      %c0_75 = arith.constant 0 : index
      %c0_76 = arith.constant 0 : index
      %153 = vector.load %arg18[%c0_75, %c0_76] : memref<1x8xf32, #tpu.memory_space<vmem>>, vector<1x8xf32>
      %154 = vector.broadcast %153 : vector<1x8xf32> to vector<2x8xf32>
      %155 = arith.addf %152, %154 : vector<2x8xf32>
      %c0_77 = arith.constant 0 : index
      %c0_78 = arith.constant 0 : index
      %156 = vector.load %arg19[%c0_77, %c0_78] : memref<2x8xf32, #tpu.memory_space<vmem>>, vector<2x8xf32>
      tpu.vector_store %arg19[%c0_77, %c0_78], %155 {strides = array<i32>} : memref<2x8xf32, #tpu.memory_space<vmem>>, vector<2x8xf32>,
    } else {
    }
    return
  }
  func.func @transform_0(%arg0: i32) -> (i32, i32) {
    %c0_i32 = arith.constant 0 : i32
    %c0_i32_0 = arith.constant 0 : i32
    %c0_i32_1 = arith.constant 0 : i32
    return %c0_i32, %c0_i32_0 : i32, i32
  }
  func.func @transform_1(%arg0: i32) -> (i32, i32) {
    %c0_i32 = arith.constant 0 : i32
    %c0_i32_0 = arith.constant 0 : i32
    %c0_i32_1 = arith.constant 0 : i32
    return %c0_i32, %c0_i32_0 : i32, i32
  }
  func.func @transform_2(%arg0: i32) -> (i32, i32) {
    %c0_i32 = arith.constant 0 : i32
    %c0_i32_0 = arith.constant 0 : i32
    %c0_i32_1 = arith.constant 0 : i32
    return %c0_i32, %c0_i32_0 : i32, i32
  }
  func.func @transform_3(%arg0: i32) -> (i32, i32) {
    %c0_i32 = arith.constant 0 : i32
    %c0_i32_0 = arith.constant 0 : i32
    %c0_i32_1 = arith.constant 0 : i32
    return %c0_i32, %c0_i32_0 : i32, i32
  }
  func.func @transform_4(%arg0: i32) -> (i32, i32, i32) {
    %c0_i32 = arith.constant 0 : i32
    %c0_i32_0 = arith.constant 0 : i32
    %c0_i32_1 = arith.constant 0 : i32
    return %arg0, %c0_i32, %c0_i32_0 : i32, i32, i32
  }
  func.func @transform_5(%arg0: i32) -> (i32, i32, i32) {
    %c0_i32 = arith.constant 0 : i32
    %c0_i32_0 = arith.constant 0 : i32
    %c0_i32_1 = arith.constant 0 : i32
    return %arg0, %c0_i32, %c0_i32_0 : i32, i32, i32
  }
  func.func @transform_6(%arg0: i32) -> (i32, i32, i32) {
    %c0_i32 = arith.constant 0 : i32
    %c0_i32_0 = arith.constant 0 : i32
    %c0_i32_1 = arith.constant 0 : i32
    return %arg0, %c0_i32, %c0_i32_0 : i32, i32, i32
  }
  func.func @transform_7(%arg0: i32) -> (i32, i32, i32) {
    %c0_i32 = arith.constant 0 : i32
    %c0_i32_0 = arith.constant 0 : i32
    %c0_i32_1 = arith.constant 0 : i32
    return %arg0, %c0_i32, %c0_i32_0 : i32, i32, i32
  }
  func.func @transform_8(%arg0: i32) -> (i32, i32, i32) {
    %c0_i32 = arith.constant 0 : i32
    %c0_i32_0 = arith.constant 0 : i32
    %c0_i32_1 = arith.constant 0 : i32
    return %arg0, %c0_i32, %c0_i32_0 : i32, i32, i32
  }
  func.func @transform_9(%arg0: i32) -> (i32, i32, i32) {
    %c0_i32 = arith.constant 0 : i32
    %c0_i32_0 = arith.constant 0 : i32
    %c0_i32_1 = arith.constant 0 : i32
    return %arg0, %c0_i32, %c0_i32_0 : i32, i32, i32
  }
  func.func @transform_10(%arg0: i32) -> (i32, i32, i32) {
    %c0_i32 = arith.constant 0 : i32
    %c0_i32_0 = arith.constant 0 : i32
    %c0_i32_1 = arith.constant 0 : i32
    return %arg0, %c0_i32, %c0_i32_0 : i32, i32, i32
  }
  func.func @transform_11(%arg0: i32) -> (i32, i32, i32) {
    %c0_i32 = arith.constant 0 : i32
    %c0_i32_0 = arith.constant 0 : i32
    %c0_i32_1 = arith.constant 0 : i32
    return %arg0, %c0_i32, %c0_i32_0 : i32, i32, i32
  }
  func.func @transform_12(%arg0: i32) -> (i32, i32, i32) {
    %c0_i32 = arith.constant 0 : i32
    %c0_i32_0 = arith.constant 0 : i32
    %c0_i32_1 = arith.constant 0 : i32
    return %arg0, %c0_i32, %c0_i32_0 : i32, i32, i32
  }
  func.func @transform_13(%arg0: i32) -> (i32, i32, i32) {
    %c0_i32 = arith.constant 0 : i32
    %c0_i32_0 = arith.constant 0 : i32
    %c0_i32_1 = arith.constant 0 : i32
    return %arg0, %c0_i32, %c0_i32_0 : i32, i32, i32
  }
  func.func @transform_14(%arg0: i32) -> (i32, i32, i32) {
    %c0_i32 = arith.constant 0 : i32
    %c0_i32_0 = arith.constant 0 : i32
    %c0_i32_1 = arith.constant 0 : i32
    return %arg0, %c0_i32, %c0_i32_0 : i32, i32, i32
  }
  func.func @transform_15(%arg0: i32) -> (i32, i32, i32) {
    %c0_i32 = arith.constant 0 : i32
    %c0_i32_0 = arith.constant 0 : i32
    %c0_i32_1 = arith.constant 0 : i32
    return %arg0, %c0_i32, %c0_i32_0 : i32, i32, i32
  }
  func.func @transform_16(%arg0: i32) -> (i32, i32) {
    %c0_i32 = arith.constant 0 : i32
    %c0_i32_0 = arith.constant 0 : i32
    %c0_i32_1 = arith.constant 0 : i32
    return %c0_i32, %c0_i32_0 : i32, i32
  }
  func.func @transform_17(%arg0: i32) -> (i32, i32) {
    %c0_i32 = arith.constant 0 : i32
    %c0_i32_0 = arith.constant 0 : i32
    %c0_i32_1 = arith.constant 0 : i32
    return %c0_i32, %c0_i32_0 : i32, i32
  }
  func.func @transform_18(%arg0: i32) -> (i32, i32) {
    %c0_i32 = arith.constant 0 : i32
    %c0_i32_0 = arith.constant 0 : i32
    %c0_i32_1 = arith.constant 0 : i32
    return %c0_i32, %c0_i32_0 : i32, i32
  }
}

</mosaic_0001>

<bundles_post_ra>
// kernel: tpu_custom_call.1
= control target key start
LH: loop header
LB: loop body
LE: loop exit
PB: predicated region body
PF: predicated region fallthrough
CT: control target
= control target key end

     0   :  { %s2390_s0 = inlined_call_operand.vmem [shape: f32[16,32], index: 0, kind: input, shape index: {}]   ;;  %s2391_s1 = inlined_call_operand.vmem [shape: f32[16,16], index: 1, kind: input, shape index: {}]   ;;  %s2392_s2 = inlined_call_operand.hbm [shape: f32[1,32], index: 2, kind: input, shape index: {}]   ;;  %s2393_s3 = inlined_call_operand.hbm [shape: f32[1,32], index: 3, kind: input, shape index: {}]   ;;  %s2394_s4 = inlined_call_operand.vmem [shape: f32[2,32,96], index: 4, kind: input, shape index: {}]   ;;  %s2395_s5 = inlined_call_operand.vmem [shape: f32[2,1,96], index: 5, kind: input, shape index: {}]   ;;  %s2396_s6 = inlined_call_operand.vmem [shape: f32[2,32,32], index: 6, kind: input, shape index: {}]   ;;  %s2397_s7 = inlined_call_operand.vmem [shape: f32[2,1,32], index: 7, kind: input, shape index: {}]   ;;  %s2398_s8 = inlined_call_operand.vmem [shape: f32[2,1,32], index: 8, kind: input, shape index: {}]   ;;  %s2399_s9 = inlined_call_operand.vmem [shape: f32[2,1,32], index: 9, kind: input, shape index: {}]   ;;  %s2400_s10 = inlined_call_operand.vmem [shape: f32[2,32,64], index: 10, kind: input, shape index: {}]   ;;  %s2401_s11 = inlined_call_operand.vmem [shape: f32[2,1,64], index: 11, kind: input, shape index: {}]   ;;  %s2402_s12 = inlined_call_operand.vmem [shape: f32[2,64,32], index: 12, kind: input, shape index: {}]   ;;  %s2403_s13 = inlined_call_operand.vmem [shape: f32[2,1,32], index: 13, kind: input, shape index: {}]   ;;  %s2404_s14 = inlined_call_operand.vmem [shape: f32[2,1,32], index: 14, kind: input, shape index: {}]   ;;  %s2405_s15 = inlined_call_operand.hbm [shape: f32[2,1,32], index: 15, kind: input, shape index: {}]   ;;  %s2406_s16 = inlined_call_operand.vmem [shape: f32[32,8], index: 16, kind: input, shape index: {}]   ;;  %s2407_s17 = inlined_call_operand.vmem [shape: f32[1,8], index: 17, kind: input, shape index: {}]   ;;  %s2408_s18 = inlined_call_operand.hbm [shape: f32[2,8], index: 18, kind: output, shape index: {}]  }
   0x1   :  { %2416 = sst [smem:[#allocation18_spill]] %s2390_s0 }
   0x2   :  { %2417 = sst [smem:[#allocation19_spill]] %s2391_s1 }
   0x3   :  { %2418 = sst [smem:[#allocation20_spill]] %s2392_s2 }
   0x4   :  { %2419 = sst [smem:[#allocation21_spill]] %s2393_s3 }
   0x5   :  { %2420 = sst [smem:[#allocation22_spill]] %s2394_s4 }
   0x6   :  { %2421 = sst [smem:[#allocation23_spill]] %s2396_s6 }
   0x7   :  { %2422 = sst [smem:[#allocation24_spill]] %s2405_s15 }
   0x8   :  { %2423 = sst [smem:[#allocation25_spill]] %s2406_s16 }
   0x9   :  { %2424 = sst [smem:[#allocation26_spill]] %s2407_s17 }
   0xa   :  { %2425 = sst [smem:[#allocation27_spill]] %s2408_s18 }
   0xb   :  { %23 = vsyncpa [#allocation4], 0 }
   0xc   :  { %24 = vsyncpa [#allocation7], 0 }
   0xd   :  { %25 = vsyncpa [#allocation5], 0  ;;  %s2068_s27 = smov 0   ;;  %s2070_s28 = smov 0  }
   0xe   :  { %s2072_s29 = smov 0   ;;  %s2074_s30 = smov 0  }
   0xf LB: > { %2426 = sst [smem:[#allocation14_spill]] %s1951_s28  ;;  %s2087_s0 = sadd.s32 4294967295, %s1959_s30   ;;  %s1959_s30 = sphi %s2074_s30, %s2446_s30   ;;  %s1955_s29 = sphi %s2072_s29, %s2449_s29   ;;  %s1951_s28 = sphi %s2070_s28, %s2448_s28   ;;  %s1947_s27 = sphi %s2068_s27, %s2447_s27  }
  0x10   : > { %2427 = sst [smem:[#allocation15_spill]] %s1955_s29  ;;  %p421_p0 = scmp.ne.s32.totalorder %s1951_s28, %s1947_s27 }
  0x11   : > { %p422_p1 = scmp.eq.s32.totalorder %s2087_s0, 0  ;;  %p1614_p2 = scmp.ge.s32.totalorder %s1959_s30, 1 }
  0x12   : > { %p495_p3 = scmp.lt.s32.totalorder %s1959_s30, 3  ;;  %p1615_p4 = scmp.ne.s32.totalorder %s2087_s0, 0 }
  0x13   : > { %p2096_p5 = por %p422_p1, %p421_p0  ;;  %s2429_s21 = sld [smem:[#allocation20_spill]] }
  0x14   : > { %p2103_p6 = pnand %p1614_p2, %p495_p3  ;;  %s1961_s23 = smov [#allocation3]  }
  0x15   : > { %s515_s24 = sshll.u32 %s1961_s23, 4  ;;  %s2431_s3 = sld [smem:[#allocation21_spill]]  ;;  %s516_s24 = int_to_ptr.vmem [resolvable:$true] %s515_s24 }
  0x16   : > { %p1676_p7 = pneg %p2103_p6  ;;  %s1962_s1 = smov [#allocation6]  }
  0x17   : > { %s527_s20 = sshll.u32 %s1962_s1, 4  ;;  %s408_s23 = sadd.s32 1, %s1955_s29  ;;  %s528_s20 = int_to_ptr.vmem [resolvable:$true] %s527_s20 }
  0x18   : > { %p1677_p8 = pnand %p1676_p7, %p422_p1  ;;  %p415_p9 = scmp.ne.s32.totalorder %s1955_s29, %s1951_s28 }
  0x19   : > { %s513_s22 = sshll.u32 %s2429_s21, 4  ;;  %s2115_s21 = sadd.s32 1, %s1959_s30   ;;  %s514_s22 = int_to_ptr.hbm [resolvable:$true] %s513_s22 }
  0x1a   : > { %1679 = dma.hbm_to_vmem [thread:$0]  (!%p1677_p8), %s514_s22, 16, %s516_s24, [#allocation4]  }
  0x1b   : > { %s525_s27 = sshll.u32 %s2431_s3, 4  ;;  %2432 = sst [smem:[#allocation16_spill]] %s2115_s21  ;;  %s526_s27 = int_to_ptr.hbm [resolvable:$true] %s525_s27 }
  0x1c   : > { %1682 = dma.hbm_to_vmem [thread:$0]  (!%p1677_p8), %s526_s27, 16, %s528_s20, [#allocation7]  }
  0x1d   : > { %s405_s18 = ssub.s32 %s1959_s30, %s2115_s21  ;;  %p416_p11 = scmp.eq.s32.totalorder %s1959_s30, 0 }
  0x1e   : > { %p406_p10 = scmp.eq.s32.totalorder %s405_s18, 0  ;;  %p1689_p12 = scmp.lt.s32.totalorder %s1959_s30, 2 }
  0x1f   : > { %s618_s25 = sand.u32 1, %s1959_s30   ;;  %p417_p13 = por %p416_p11, %p415_p9 }
  0x20   : > { %s2126_s26 = scalar_select %p406_p10, %s1955_s29, %s408_s23  }
  0x21   : > { %s620_s3 = sand.u32 1, %s1955_s29   ;;  %s2434_s15 = sld [smem:[#allocation24_spill]] }
  0x22   : > { %2433 = sst [smem:[#allocation17_spill]] %s2126_s26  ;;  %s621_s27 = scalar_lea.vmem [#allocation8], %s620_s3 }
  0x23   : > { %s628_s1 = sshll.u32 %s621_s27, 4  ;;  %p2133_p0 = pnand %p1689_p12, %p417_p13  ;;  %s629_s1 = int_to_ptr.vmem [resolvable:$true] %s628_s1 }
  0x24   : > { %s619_s18 = scalar_lea.sflag [#allocation4], %s618_s25 }
  0x25   : > { %p1859_p3 = pneg %p2133_p0 }
  0x27   : > { %s624_s22 = scalar_lea.hbm %s2434_s15, %s1959_s30  ;;  %s1862_s3 = scalar_lea.hbm %s2434_s15, 2 }
  0x28   : > { %s626_s24 = sshll.u32 %s624_s22, 4  ;;  %s627_s24 = int_to_ptr.hbm [resolvable:$true] %s626_s24 }
  0x29   : > { %s1855_s21 = sshra.s32 %s627_s24, 4  ;;  %s1856_s21 = int_to_ptr.hbm [resolvable:$true] %s1855_s21 }
  0x2a   : > { %s1857_s23 = scalar_lea.hbm %s1856_s21, 1  ;;  %p1863_p9 = scmp.lt.s32.totalorder %s1856_s21, %s2434_s15 }
  0x2b   : > { %p1858_p2 = scmp.ne.s32.totalorder %s1856_s21, %s1857_s23  ;;  %p1864_p10 = scmp.lt.s32.totalorder %s1862_s3, %s1857_s23 }
  0x2d   : > { %p1860_p7 = pnand %p1859_p3, %p1858_p2  ;;  %p1865_p11 = por %p1864_p10, %p1863_p9 }
  0x2f   : > { %p1861_p8 = pneg %p1860_p7 }
  0x31   : > { %p1866_p12 = pnand %p1865_p11, %p1861_p8 }
  0x33   : > { %1869 = shalt.err (!%p1866_p12)
}
  0x34   : > { %1686 = dma.hbm_to_vmem [thread:$0]  (!%p2133_p0), %s627_s24, 16, %s629_s1, %s619_s18  }
  0x35   : > { %637 = sbr.rel (%p2103_p6) target bundleno = 2508 (0x9cc), region = 92 }
  0x3a   : > { %1930 = dma.done.wait (%p422_p1), [#allocation4], 16  }
  0x3b   : > { %1932 = vsyncadd (%p422_p1), [#allocation4], 4294967280 }
  0x3c   : > { %1934 = dma.done.wait (%p422_p1), [#allocation7], 16  }
  0x3d   : > { %1936 = vsyncadd (%p422_p1), [#allocation7], 4294967280  ;;  %s649_s21 = sand.u32 1, %s2087_s0   ;;  %s651_s25 = sand.u32 1, %s1951_s28  }
  0x3e   : > { %s650_s24 = scalar_lea.sflag [#allocation4], %s649_s21  ;;  %s2159_s2 = scalar_lea.vmem [#allocation8], %s651_s25 }
  0x3f   : > { %1938 = dma.done.wait (%p2096_p5), %s650_s24, 16  }
  0x40   : > { %1940 = vsyncadd (%p2096_p5), %s650_s24, 4294967280  ;;  %p741_p6 = scmp.lt.s32.totalorder %s2087_s0, 1  ;;  %s2436_s4 = sld [smem:[#allocation22_spill]] }
  0x41   : > { %s2437_s6 = sld [smem:[#allocation23_spill]] }
  0x42   : > { %s2167_s27 = scalar_select %p741_p6, %s2087_s0, 1 }
  0x43   : > { %s2438_s3 = sld [smem:[#allocation18_spill]] (!%p1615_p4) }
  0x44   : > { %s1658_s1 = sshll.u32 %s2167_s27, 5  ;;  %s759_s29 = scalar_lea.vmem %s2398_s8, %s2167_s27 }
  0x45   : > { %s1661_s28 = sshll.u32 %s2167_s27, 6  ;;  %s778_s20 = scalar_lea.vmem %s2403_s13, %s2167_s27 }
  0x46   : > { %s2177_s17 = scalar_lea.vmem %s2436_s4, %s1658_s1  ;;  %s2199_s4 = scalar_lea.vmem %s2400_s10, %s1658_s1 }
  0x47   : > { %s2182_s22 = scalar_lea.vmem %s2437_s6, %s1658_s1  ;;  %s770_s6 = scalar_lea.vmem %s2401_s11, %s2167_s27 }
  0x48   : > { %s2209_s24 = scalar_lea.vmem %s2402_s12, %s1661_s28  ;;  %s781_s23 = scalar_lea.vmem %s2404_s14, %s2167_s27 }
  0x49   : > { %785 = sbr.rel (%p1615_p4) target bundleno = 356 (0x164), region = 108 }
  0x4e   : > { %v786_v0 = vld [vmem:[%s2438_s3] sm:$0xff]  ;;  %vm790_vm0 = vcmask 261120   ;;  %v787_v2 = vld [vmem:[%s2438_s3 + $0x8] sm:$0xff]  ;;  %v1963_v4 = vmov 32.0   ;;  %v1738_v35 = vld [vmem:[#allocation3] ss:$0 sm:$0xff] }
  0x4f   : > { %v791_v1 = vsel %vm790_vm0, %v786_v0, 0.0  ;;  %v794_v3 = vsel %vm790_vm0, %v787_v2, 0.0  ;;  %1740 = vrcp.f32 %v1963_v4  ;;  %v1739_v38 = vld [vmem:[#allocation6] ss:$0 sm:$0xff] }
  0x50   : > { %792 = vadd.xlane.f32.xlu0 %v791_v1 }
  0x55   : > { %v1741_v5 = vpop.eup %1740 }
  0x56   : > { %v798_v6 = vmul.f32 32.0, %v1741_v5  ;;  %vm802_vm1 = vweird.f32 %v1741_v5 }
  0x58   : > { %795 = vadd.xlane.f32.xlu0 %v794_v3  ;;  %v799_v7 = vsub.f32 1.0, %v798_v6 }
  0x5a   : > { %v800_v8 = vmul.f32 %v1741_v5, %v799_v7 }
  0x5c   : > { %v801_v9 = vadd.f32 %v1741_v5, %v800_v8 }
  0x5e   : > { %v803_v10 = vsel %vm802_vm1, %v1741_v5, %v801_v9 }
  0xc3   : > { %v793_v11 = vpop.xlane.xlu0 %792 }
  0xc4   : > { %v804_v12 = vmul.f32 %v803_v10, %v793_v11 }
  0xc6   : > { %v806_v13 = vsub.f32 %v786_v0, %v804_v12 }
  0xc8   : > { %v808_v14 = vmul.f32 %v806_v13, %v806_v13 }
  0xca   : > { %v810_v15 = vsel %vm790_vm0, %v808_v14, 0.0 }
  0xcb   : > { %811 = vadd.xlane.f32.xlu1 %v810_v15  ;;  %v796_v16 = vpop.xlane.xlu0 %795 }
  0xcc   : > { %v805_v17 = vmul.f32 %v803_v10, %v796_v16 }
  0xce   : > { %v807_v18 = vsub.f32 %v787_v2, %v805_v17 }
  0xd0   : > { %v809_v19 = vmul.f32 %v807_v18, %v807_v18 }
  0xd2   : > { %v813_v20 = vsel %vm790_vm0, %v809_v19, 0.0 }
  0xd3   : > { %814 = vadd.xlane.f32.xlu1 %v813_v20 }
 0x13e   : > { %v812_v21 = vpop.xlane.xlu1 %811 }
 0x13f   : > { %v816_v22 = vmul.f32 %v812_v21, %v803_v10 }
 0x141   : > { %v818_v23 = vadd.f32 1e-05, %v816_v22 }
 0x143   : > { %1742 = vrsqrt.f32 %v818_v23  ;;  %vm826_vm3 = vweird.f32 %v818_v23 }
 0x146   : > { %v815_v24 = vpop.xlane.xlu1 %814 }
 0x147   : > { %v817_v25 = vmul.f32 %v815_v24, %v803_v10 }
 0x149   : > { %v1743_v26 = vpop.eup %1742  ;;  %v819_v27 = vadd.f32 1e-05, %v817_v25 }
 0x14a   : > { %v821_v28 = vmul.f32 %v1743_v26, %v818_v23  ;;  %vm827_vm2 = vweird.f32 %v1743_v26 }
 0x14b   : > { %1744 = vrsqrt.f32 %v819_v27  ;;  %vm828_vm4 = vmor %vm826_vm3, %vm827_vm2  ;;  %vm836_vm6 = vweird.f32 %v819_v27 }
 0x14c   : > { %v822_v29 = vmul.f32 %v1743_v26, %v821_v28 }
 0x14e   : > { %v823_v30 = vmul.f32 0.5, %v822_v29 }
 0x150   : > { %v824_v31 = vsub.f32 1.5, %v823_v30 }
 0x151   : > { %v1745_v32 = vpop.eup %1744 }
 0x152   : > { %v825_v33 = vmul.f32 %v1743_v26, %v824_v31  ;;  %v831_v34 = vmul.f32 %v1745_v32, %v819_v27  ;;  %vm837_vm5 = vweird.f32 %v1745_v32 }
 0x153   : > { %vm838_vm7 = vmor %vm836_vm6, %vm837_vm5 }
 0x154   : > { %v829_v36 = vsel %vm828_vm4, %v1743_v26, %v825_v33  ;;  %v832_v37 = vmul.f32 %v1745_v32, %v831_v34 }
 0x155   : > { %v840_v39 = vmul.f32 %v829_v36, %v806_v13 }
 0x156   : > { %v833_v40 = vmul.f32 0.5, %v832_v37 }
 0x157   : > { %v845_v41 = vmul.f32 %v1738_v35, %v840_v39 }
 0x158   : > { %v834_v42 = vsub.f32 1.5, %v833_v40 }
 0x159   : > { %v850_v43 = vadd.f32 %v1739_v38, %v845_v41 }
 0x15a   : > { %v835_v44 = vmul.f32 %v1745_v32, %v834_v42 }
 0x15b   : > { %852 = vst.msk [vmem:[#allocation2] sm:$0xff] %vm790_vm0, %v850_v43 }
 0x15c   : > { %v839_v45 = vsel %vm838_vm7, %v1745_v32, %v835_v44 }
 0x15d   : > { %v841_v46 = vmul.f32 %v839_v45, %v807_v18 }
 0x15f   : > { %v846_v47 = vmul.f32 %v1738_v35, %v841_v46 }
 0x161   : > { %v851_v48 = vadd.f32 %v1739_v38, %v846_v47 }
 0x163   : > { %853 = vst.msk [vmem:[#allocation2 + $0x8] sm:$0xff] %vm790_vm0, %v851_v48 }
 0x164 PF: > { %v859_v49 = vld [vmem:[%s2177_s17 + $0x18] sm:$0xff]  ;;  %v858_v50 = vld [vmem:[%s2177_s17 + $0x10] sm:$0xff]  ;;  %v857_v51 = vld [vmem:[%s2177_s17 + $0x8] sm:$0xff]  ;;  %vm864_vm8 = vcmask 261120   ;;  %s2439_s25 = scalar_lea.vmem %s2395_s5, %s2167_s27  ;;  %s1965_s15 = smov 80   ;;  %vm904_vm9 = vcmask 130048  }
 0x165   : > { %883 = vmatpush.msra.mxu0 %v859_v49  ;;  %v856_v52 = vld [vmem:[%s2177_s17] sm:$0xff]  ;;  %s1964_s17 = smov 112   ;;  %s1966_s26 = smov 96   ;;  %vm1270_vm1 = vcmask 523264  }
 0x166   : > { %v2237_v53 = vld [vmem:[#allocation2] sm:$0xff]  ;;  %s2440_s16 = sld [smem:[#allocation19_spill]]  ;;  %s1967_s19 = smov 64  }
 0x167   : > { %884 = vmatpush.msra.mxu0 %v858_v50  ;;  %v1756_v55 = vld [vmem:[%s2439_s25] ss:$0 sm:$0xff]  ;;  %s1968_s21 = smov 48   ;;  %s1969_s25 = smov 16  }
 0x168   : > { %s2442_s28 = scalar_lea.vmem %s2399_s9, %s2167_s27  ;;  %p1650_p1 = scmp.ne.s32.totalorder %s2087_s0, 1 }
 0x169   : > { %885 = vmatpush.msra.mxu0 %v857_v51  ;;  %s2444_s1 = sld [smem:[#allocation26_spill]] (!%p1650_p1) }
 0x16a   : > { %v2241_v54 = vld [vmem:[#allocation2 + $0x8] sm:$0xff] }
 0x16b   : > { %886 = vmatpush.msra.mxu0 %v856_v52 }
 0x16c   : > { %1630 = vmatmul.msk.f32.vlgmr.msra.gmra.mxu0 %vm864_vm8, %v2237_v53  ;;  %v896_v5 = vld [vmem:[%s2440_s16] sm:$0xff]  ;;  %v897_v10 = vld [vmem:[%s2440_s16 + $0x8] sm:$0xff] }
 0x174   : > { %1631 = vmatmul.msk.f32.gmra.mxu0 %vm864_vm8, %v2241_v54 }
 0x1e9   : > { %v888_v56 = vpop.f32.mrf.mxu0 }
 0x1ea   : > { %v889_v57 = vadd.f32 %v1756_v55, %v888_v56 }
 0x1ec   : > { %v894_v58 = vmul.f32 0.25, %v889_v57 }
 0x1ee   : > { %995 = vrot.lane.b32.xlu2 %v894_v58, %s1964_s17 }
 0x1f1   : > { %v891_v59 = vpop.f32.mrf.mxu0 }
 0x1f2   : > { %v892_v60 = vadd.f32 %v1756_v55, %v891_v59  ;;  %v1104_v59 = vld [vmem:[%s2182_s22 + $0x18] sm:$0xff] }
 0x1f3   : > { %1127 = vmatpush.msrb.mxu0 %v1104_v59 }
 0x1f4   : > { %1001 = vrot.lane.b32.xlu1 %v892_v60, %s1965_s15  ;;  %902 = vrot.lane.b32.xlu0 %v892_v60, %s1966_s26  ;;  %v895_v61 = vmul.f32 0.25, %v892_v60  ;;  %v2250_v62 = vpack.i.bf16 %v889_v57, %v892_v60  ;;  %v1103_v60 = vld [vmem:[%s2182_s22 + $0x10] sm:$0xff] }
 0x1f5   : > { %1128 = vmatpush.msrb.mxu0 %v1103_v60 }
 0x1f6   : > { %997 = vrot.lane.b32.xlu2 %v895_v61, %s1964_s17 }
 0x1fc   : > { %999 = vrot.lane.b32.xlu1 %v889_v57, %s1965_s15  ;;  %900 = vrot.lane.b32.xlu0 %v889_v57, %s1966_s26  ;;  %s2441_s26 = scalar_lea.vmem %s2397_s7, %s2167_s27 }
 0x248   : > { %v996_v3 = vpop.permute.xlu2 %995 }
 0x250   : > { %v998_v4 = vpop.permute.xlu2 %997 }
 0x266   : > { %v1002_v63 = vpop.permute.xlu1 %1001  ;;  %v903_v0 = vpop.permute.xlu0 %902 }
 0x267   : > { %1632 = vmatpush.xpose.msk.msra.mxu1 %vm904_vm9, %v903_v0  ;;  %1638 = vmatpush.xpose.msk.msra.mxu3 %vm904_vm9, %v1002_v63 }
 0x26e   : > { %v1000_v1 = vpop.permute.xlu1 %999  ;;  %v901_v2 = vpop.permute.xlu0 %900 }
 0x26f   : > { %1633 = vmatpush.xpose.msk.msra.mxu1 %vm904_vm9, %v901_v2  ;;  %1639 = vmatpush.xpose.msk.msra.mxu3 %vm904_vm9, %v1000_v1  ;;  %v1101_v2 = vld [vmem:[%s2182_s22] sm:$0xff] }
 0x272   : > { %1634 = vmatmul.msk.f32.vlgmr.msra.gmra.mxu1 %vm904_vm9, %v894_v58  ;;  %1640 = vmatmul.msk.f32.vlgmr.msra.gmra.mxu3 %vm904_vm9, %v996_v3 }
 0x27a   : > { %1635 = vmatmul.msk.f32.gmra.mxu1 %vm904_vm9, %v895_v61  ;;  %1641 = vmatmul.msk.f32.gmra.mxu3 %vm904_vm9, %v998_v4  ;;  %v1102_v61 = vld [vmem:[%s2182_s22 + $0x8] sm:$0xff] }
 0x27b   : > { %1129 = vmatpush.msrb.mxu0 %v1102_v61 }
 0x27d   : > { %1130 = vmatpush.msrb.mxu0 %v1101_v2  ;;  %v1264_v2 = vld [vmem:[%s2209_s24 + $0x30] sm:$0xff] }
 0x2ef   : > { %v932_v6 = vpop.f32.mrf.mxu1 }
 0x2f0   : > { %v933_v7 = vadd.f32 %v932_v6, %v896_v5 }
 0x2f2   : > { %v938_v8 = vsel %vm904_vm9, %v933_v7, -inf }
 0x2f3   : > { %939 = vmax.xlane.f32.xlu0 %v938_v8 }
 0x2f5   : > { %v1028_v9 = vpop.f32.mrf.mxu3 }
 0x2f6   : > { %v1029_v11 = vadd.f32 %v1028_v9, %v896_v5 }
 0x2f7   : > { %v935_v12 = vpop.f32.mrf.mxu1 }
 0x2f8   : > { %v936_v13 = vadd.f32 %v935_v12, %v897_v10  ;;  %v1034_v14 = vsel %vm904_vm9, %v1029_v11, -inf }
 0x2f9   : > { %1035 = vmax.xlane.f32.xlu2 %v1034_v14 }
 0x2fa   : > { %v941_v15 = vsel %vm904_vm9, %v936_v13, -inf }
 0x2fb   : > { %942 = vmax.xlane.f32.xlu1 %v941_v15 }
 0x2fd   : > { %v1031_v16 = vpop.f32.mrf.mxu3 }
 0x2fe   : > { %v1032_v17 = vadd.f32 %v1031_v16, %v897_v10  ;;  %v1970_v16 = vmov 32.0  }
 0x300   : > { %v1037_v18 = vsel %vm904_vm9, %v1032_v17, -inf }
 0x301   : > { %1038 = vmax.xlane.f32.xlu2 %v1037_v18 }
 0x314   : > { %1747 = vrot.lane.b32.xlu1 %v2250_v62, %s1967_s19 }
 0x366   : > { %v940_v19 = vpop.xlane.xlu0 %939 }
 0x367   : > { %v944_v20 = vsub.f32 %v933_v7, %v940_v19  ;;  %v1757_v7 = vld [vmem:[%s2441_s26] ss:$0 sm:$0xff] }
 0x369   : > { %v946_v21 = vmul.f32 1.442695, %v944_v20 }
 0x36b   : > { %1764 = vpow2.f32 %v946_v21 }
 0x36c   : > { %v1036_v22 = vpop.xlane.xlu2 %1035 }
 0x36d   : > { %v1040_v23 = vsub.f32 %v1029_v11, %v1036_v22 }
 0x36e   : > { %v943_v24 = vpop.xlane.xlu1 %942 }
 0x36f   : > { %v1042_v25 = vmul.f32 1.442695, %v1040_v23  ;;  %v945_v26 = vsub.f32 %v936_v13, %v943_v24 }
 0x371   : > { %v1765_v27 = vpop.eup %1764  ;;  %1766 = vpow2.f32 %v1042_v25  ;;  %v948_v28 = vmul.f32 1.442695, %v945_v26 }
 0x372   : > { %v950_v29 = vsel %vm904_vm9, %v1765_v27, 0.0 }
 0x373   : > { %1768 = vpow2.f32 %v948_v28  ;;  %951 = vadd.xlane.f32.xlu0 %v950_v29 }
 0x374   : > { %v1039_v30 = vpop.xlane.xlu2 %1038 }
 0x375   : > { %v1041_v31 = vsub.f32 %v1032_v17, %v1039_v30 }
 0x377   : > { %v1767_v32 = vpop.eup %1766  ;;  %v1044_v33 = vmul.f32 1.442695, %v1041_v31  ;;  %v1206_v31 = vld [vmem:[%s2199_s4 + $0x18] sm:$0xff] }
 0x378   : > { %v1046_v36 = vsel %vm904_vm9, %v1767_v32, 0.0  ;;  %1229 = vmatpush.msrb.mxu1 %v1206_v31  ;;  %v1761_v31 = vld [vmem:[%s778_s20] ss:$0 sm:$0xff] }
 0x379   : > { %v1769_v34 = vpop.eup %1768  ;;  %1770 = vpow2.f32 %v1044_v33  ;;  %v1204_v33 = vld [vmem:[%s2199_s4 + $0x8] sm:$0xff] }
 0x37a   : > { %v953_v35 = vsel %vm904_vm9, %v1769_v34, 0.0 }
 0x37b   : > { %954 = vadd.xlane.f32.xlu2 %v953_v35  ;;  %1047 = vadd.xlane.f32.xlu0 %v1046_v36 }
 0x37f   : > { %v1771_v37 = vpop.eup %1770 }
 0x380   : > { %v1049_v38 = vsel %vm904_vm9, %v1771_v37, 0.0 }
 0x383   : > { %1050 = vadd.xlane.f32.xlu0 %v1049_v38 }
 0x386   : > { %v1748_v39 = vpop.permute.xlu1 %1747 }
 0x387   : > { %v1749_v40 = vunpack.i.l.bf16 %v1748_v39  ;;  %v1750_v41 = vunpack.i.h.bf16 %v1748_v39 }
 0x389   : > { %986 = vmatpush.msra.mxu2 %v1749_v40 }
 0x38b   : > { %987 = vmatpush.msra.mxu2 %v1750_v41 }
 0x393   : > { %1752 = vrot.lane.b32.xlu2 %v2250_v62, %s1968_s21 }
 0x3e6   : > { %v952_v42 = vpop.xlane.xlu0 %951 }
 0x3e7   : > { %1772 = vrcp.f32 %v952_v42 }
 0x3ed   : > { %v1773_v43 = vpop.eup %1772 }
 0x3ee   : > { %v955_v44 = vpop.xlane.xlu2 %954  ;;  %v958_v45 = vmul.f32 %v1773_v43, %v1765_v27  ;;  %v1048_v46 = vpop.xlane.xlu0 %1047 }
 0x3ef   : > { %1774 = vrcp.f32 %v955_v44 }
 0x3f0   : > { %1636 = vmatmul.msk.f32.vlgmr.msra.gmra.mxu2 %vm904_vm9, %v958_v45  ;;  %1776 = vrcp.f32 %v1048_v46 }
 0x3f5   : > { %v1775_v47 = vpop.eup %1774 }
 0x3f6   : > { %v1753_v48 = vpop.permute.xlu2 %1752  ;;  %v959_v49 = vmul.f32 %v1775_v47, %v1769_v34  ;;  %v1051_v52 = vpop.xlane.xlu0 %1050  ;;  %v1203_v34 = vld [vmem:[%s2199_s4] sm:$0xff] }
 0x3f7   : > { %v1754_v50 = vunpack.i.l.bf16 %v1753_v48  ;;  %v1755_v51 = vunpack.i.h.bf16 %v1753_v48  ;;  %v1777_v55 = vpop.eup %1776  ;;  %1778 = vrcp.f32 %v1051_v52 }
 0x3f8   : > { %1637 = vmatmul.msk.f32.gmra.mxu2 %vm904_vm9, %v959_v49  ;;  %v1054_v56 = vmul.f32 %v1777_v55, %v1767_v32  ;;  %1780 = vrcp.f32 %v1970_v16  ;;  %v1205_v32 = vld [vmem:[%s2199_s4 + $0x10] sm:$0xff]  ;;  %v1758_v49 = vld [vmem:[%s759_s29] ss:$0 sm:$0xff] }
 0x3f9   : > { %1082 = vmatpush.msrb.mxu2 %v1754_v50  ;;  %1230 = vmatpush.msrb.mxu1 %v1205_v32  ;;  %v1759_v55 = vld [vmem:[%s2442_s28] ss:$0 sm:$0xff] }
 0x3fb   : > { %1083 = vmatpush.msrb.mxu2 %v1755_v51  ;;  %1231 = vmatpush.msrb.mxu1 %v1204_v33 }
 0x3fd   : > { %v1779_v57 = vpop.eup %1778  ;;  %1232 = vmatpush.msrb.mxu1 %v1203_v34 }
 0x3fe   : > { %v1055_v58 = vmul.f32 %v1779_v57, %v1771_v37  ;;  %v1781_v17 = vpop.eup %1780 }
 0x3ff   : > { %v1149_v18 = vmul.f32 32.0, %v1781_v17  ;;  %vm1153_vm10 = vweird.f32 %v1781_v17 }
 0x400   : > { %1642 = vmatmul.msk.f32.vlgmr.msrb.gmra.mxu2 %vm904_vm9, %v1054_v56 }
 0x401   : > { %v1150_v19 = vsub.f32 1.0, %v1149_v18 }
 0x403   : > { %v1151_v20 = vmul.f32 %v1781_v17, %v1150_v19 }
 0x405   : > { %v1152_v21 = vadd.f32 %v1781_v17, %v1151_v20 }
 0x408   : > { %1643 = vmatmul.msk.f32.gmra.mxu2 %vm904_vm9, %v1055_v58 }
 0x473   : > { %v989_v62 = vpop.f32.mrf.mxu2 }
 0x47b   : > { %v992_v63 = vpop.f32.mrf.mxu2 }
 0x483   : > { %v1085_v0 = vpop.f32.mrf.mxu2 }
 0x484   : > { %1093 = vrot.lane.b32.xlu0 %v1085_v0, %s1969_s25 }
 0x48b   : > { %v1088_v1 = vpop.f32.mrf.mxu2 }
 0x48c   : > { %1095 = vrot.lane.b32.xlu1 %v1088_v1, %s1969_s25  ;;  %v1265_v1 = vld [vmem:[%s2209_s24 + $0x38] sm:$0xff] }
 0x48d   : > { %1285 = vmatpush.msrb.mxu3 %v1265_v1 }
 0x48f   : > { %1286 = vmatpush.msrb.mxu3 %v1264_v2  ;;  %v1762_v2 = vld [vmem:[%s781_s23] ss:$0 sm:$0xff]  ;;  %s2443_s23 = sld [smem:[#allocation25_spill]] (!%p1650_p1) }
 0x4f6   : > { %v1094_v3 = vpop.permute.xlu0 %1093 }
 0x4f7   : > { %v1099_v4 = vsel %vm904_vm9, %v989_v62, %v1094_v3  ;;  %v1263_v3 = vld [vmem:[%s2209_s24 + $0x28] sm:$0xff] }
 0x4f8   : > { %1644 = vmatmul.msk.f32.vlgmr.msrb.gmra.mxu0 %vm864_vm8, %v1099_v4  ;;  %1287 = vmatpush.msrb.mxu3 %v1263_v3  ;;  %v1262_v4 = vld [vmem:[%s2209_s24 + $0x20] sm:$0xff] }
 0x4fa   : > { %1288 = vmatpush.msrb.mxu3 %v1262_v4  ;;  %v1763_v4 = vld [vmem:[%s2159_s2] ss:$0 sm:$0xff] }
 0x4fe   : > { %v1096_v5 = vpop.permute.xlu1 %1095 }
 0x4ff   : > { %v1100_v6 = vsel %vm904_vm9, %v992_v63, %v1096_v5  ;;  %v1261_v5 = vld [vmem:[%s2209_s24 + $0x18] sm:$0xff] }
 0x500   : > { %1645 = vmatmul.msk.f32.gmra.mxu0 %vm864_vm8, %v1100_v6  ;;  %v1260_v6 = vld [vmem:[%s2209_s24 + $0x10] sm:$0xff]  ;;  %1289 = vmatpush.msrb.mxu3 %v1261_v5 }
 0x502   : > { %1290 = vmatpush.msrb.mxu3 %v1260_v6 }
 0x575   : > { %v1132_v8 = vpop.f32.mrf.mxu0 }
 0x576   : > { %v1133_v9 = vadd.f32 %v1757_v7, %v1132_v8  ;;  %v1258_v8 = vld [vmem:[%s2209_s24] sm:$0xff] }
 0x578   : > { %v1138_v10 = vadd.f32 %v1133_v9, %v2237_v53  ;;  %v2297_v53 = vsel %vm1153_vm10, %v1781_v17, %v1152_v21  ;;  %v1760_v9 = vld [vmem:[%s770_s6] ss:$0 sm:$0xff] }
 0x57a   : > { %v1142_v11 = vsel %vm864_vm8, %v1138_v10, 0.0 }
 0x57b   : > { %1143 = vadd.xlane.f32.xlu1 %v1142_v11 }
 0x57d   : > { %v1135_v12 = vpop.f32.mrf.mxu0 }
 0x57e   : > { %v1136_v13 = vadd.f32 %v1757_v7, %v1135_v12  ;;  %v1259_v7 = vld [vmem:[%s2209_s24 + $0x8] sm:$0xff] }
 0x57f   : > { %1291 = vmatpush.msrb.mxu3 %v1259_v7 }
 0x580   : > { %v1139_v14 = vadd.f32 %v1136_v13, %v2241_v54 }
 0x581   : > { %1292 = vmatpush.msrb.mxu3 %v1258_v8 }
 0x582   : > { %v1145_v15 = vsel %vm864_vm8, %v1139_v14, 0.0 }
 0x583   : > { %1146 = vadd.xlane.f32.xlu2 %v1145_v15 }
 0x5ee   : > { %v1144_v22 = vpop.xlane.xlu1 %1143 }
 0x5ef   : > { %v1155_v23 = vmul.f32 %v2297_v53, %v1144_v22 }
 0x5f1   : > { %v1157_v54 = vsub.f32 %v1138_v10, %v1155_v23 }
 0x5f3   : > { %v1159_v24 = vmul.f32 %v1157_v54, %v1157_v54 }
 0x5f5   : > { %v1161_v25 = vsel %vm864_vm8, %v1159_v24, 0.0 }
 0x5f6   : > { %v1147_v26 = vpop.xlane.xlu2 %1146  ;;  %1162 = vadd.xlane.f32.xlu0 %v1161_v25 }
 0x5f7   : > { %v1156_v27 = vmul.f32 %v2297_v53, %v1147_v26 }
 0x5f9   : > { %v1158_v28 = vsub.f32 %v1139_v14, %v1156_v27 }
 0x5fb   : > { %v1160_v29 = vmul.f32 %v1158_v28, %v1158_v28 }
 0x5fd   : > { %v1164_v30 = vsel %vm864_vm8, %v1160_v29, 0.0 }
 0x5fe   : > { %1165 = vadd.xlane.f32.xlu1 %v1164_v30 }
 0x669   : > { %v1163_v35 = vpop.xlane.xlu0 %1162 }
 0x66a   : > { %v1167_v36 = vmul.f32 %v1163_v35, %v2297_v53 }
 0x66c   : > { %v1169_v37 = vadd.f32 1e-05, %v1167_v36 }
 0x66e   : > { %1782 = vrsqrt.f32 %v1169_v37  ;;  %vm1177_vm12 = vweird.f32 %v1169_v37 }
 0x671   : > { %v1166_v38 = vpop.xlane.xlu1 %1165 }
 0x672   : > { %v1168_v39 = vmul.f32 %v1166_v38, %v2297_v53 }
 0x674   : > { %v1783_v40 = vpop.eup %1782  ;;  %v1170_v41 = vadd.f32 1e-05, %v1168_v39 }
 0x675   : > { %v1172_v42 = vmul.f32 %v1783_v40, %v1169_v37  ;;  %vm1178_vm11 = vweird.f32 %v1783_v40 }
 0x676   : > { %1784 = vrsqrt.f32 %v1170_v41  ;;  %vm1179_vm13 = vmor %vm1177_vm12, %vm1178_vm11  ;;  %vm1187_vm15 = vweird.f32 %v1170_v41 }
 0x677   : > { %v1173_v43 = vmul.f32 %v1783_v40, %v1172_v42 }
 0x679   : > { %v1174_v44 = vmul.f32 0.5, %v1173_v43 }
 0x67b   : > { %v1175_v45 = vsub.f32 1.5, %v1174_v44 }
 0x67c   : > { %v1785_v46 = vpop.eup %1784 }
 0x67d   : > { %v1176_v47 = vmul.f32 %v1783_v40, %v1175_v45  ;;  %v1182_v48 = vmul.f32 %v1785_v46, %v1170_v41  ;;  %vm1188_vm14 = vweird.f32 %v1785_v46 }
 0x67e   : > { %vm1189_vm0 = vmor %vm1187_vm15, %vm1188_vm14 }
 0x67f   : > { %v1180_v50 = vsel %vm1179_vm13, %v1783_v40, %v1176_v47  ;;  %v1183_v51 = vmul.f32 %v1785_v46, %v1182_v48 }
 0x680   : > { %v1191_v52 = vmul.f32 %v1180_v50, %v1157_v54 }
 0x681   : > { %v1184_v56 = vmul.f32 0.5, %v1183_v51 }
 0x682   : > { %v1196_v57 = vmul.f32 %v1758_v49, %v1191_v52 }
 0x683   : > { %v1185_v58 = vsub.f32 1.5, %v1184_v56 }
 0x684   : > { %v1201_v59 = vadd.f32 %v1759_v55, %v1196_v57 }
 0x685   : > { %v1186_v60 = vmul.f32 %v1785_v46, %v1185_v58 }
 0x686   : > { %1646 = vmatmul.msk.f32.vlgmr.msrb.gmra.mxu1 %vm864_vm8, %v1201_v59 }
 0x687   : > { %v1190_v61 = vsel %vm1189_vm0, %v1785_v46, %v1186_v60 }
 0x688   : > { %v1192_v62 = vmul.f32 %v1190_v61, %v1158_v28 }
 0x68a   : > { %v1197_v63 = vmul.f32 %v1758_v49, %v1192_v62 }
 0x68c   : > { %v1202_v0 = vadd.f32 %v1759_v55, %v1197_v63 }
 0x68e   : > { %1647 = vmatmul.msk.f32.gmra.mxu1 %vm864_vm8, %v1202_v0 }
 0x703   : > { %v1234_v10 = vpop.f32.mrf.mxu1 }
 0x704   : > { %v1235_v11 = vadd.f32 %v1760_v9, %v1234_v10 }
 0x706   : > { %v1240_v12 = vmul.f32 %v1235_v11, %v1235_v11 }
 0x708   : > { %v1242_v13 = vmul.f32 %v1240_v12, %v1235_v11 }
 0x70a   : > { %v1244_v14 = vmul.f32 0.044715, %v1242_v13 }
 0x70b   : > { %v1237_v15 = vpop.f32.mrf.mxu1 }
 0x70c   : > { %v1246_v16 = vadd.f32 %v1244_v14, %v1235_v11  ;;  %v1238_v17 = vadd.f32 %v1760_v9, %v1237_v15 }
 0x70e   : > { %v1248_v18 = vmul.f32 0.7978846, %v1246_v16  ;;  %v1241_v19 = vmul.f32 %v1238_v17, %v1238_v17 }
 0x710   : > { %1786 = vtanh.f32 %v1248_v18  ;;  %v1243_v20 = vmul.f32 %v1241_v19, %v1238_v17 }
 0x712   : > { %v1245_v21 = vmul.f32 0.044715, %v1243_v20 }
 0x714   : > { %v1247_v22 = vadd.f32 %v1245_v21, %v1238_v17 }
 0x716   : > { %v1787_v23 = vpop.eup %1786  ;;  %v1249_v54 = vmul.f32 0.7978846, %v1247_v22 }
 0x717   : > { %v1252_v24 = vadd.f32 1.0, %v1787_v23 }
 0x718   : > { %1788 = vtanh.f32 %v1249_v54 }
 0x719   : > { %v1254_v25 = vmul.f32 0.5, %v1252_v24 }
 0x71b   : > { %v1256_v26 = vmul.f32 %v1254_v25, %v1235_v11 }
 0x71d   : > { %1648 = vmatmul.msk.f32.vlgmr.msrb.gmra.mxu3 %vm1270_vm1, %v1256_v26 }
 0x71e   : > { %v1789_v27 = vpop.eup %1788 }
 0x71f   : > { %v1253_v28 = vadd.f32 1.0, %v1789_v27 }
 0x721   : > { %v1255_v29 = vmul.f32 0.5, %v1253_v28 }
 0x723   : > { %v1257_v30 = vmul.f32 %v1255_v29, %v1238_v17 }
 0x725   : > { %1649 = vmatmul.msk.f32.gmra.mxu3 %vm1270_vm1, %v1257_v30 }
 0x7a0   : > { %v1294_v32 = vpop.f32.mrf.mxu3 }
 0x7a1   : > { %v1295_v33 = vadd.f32 %v1761_v31, %v1294_v32 }
 0x7a3   : > { %v1300_v34 = vadd.f32 %v1295_v33, %v1201_v59 }
 0x7a5   : > { %v1304_v35 = vsel %vm864_vm8, %v1300_v34, 0.0 }
 0x7a6   : > { %1305 = vadd.xlane.f32.xlu2 %v1304_v35 }
 0x7a8   : > { %v1297_v36 = vpop.f32.mrf.mxu3 }
 0x7a9   : > { %v1298_v37 = vadd.f32 %v1761_v31, %v1297_v36 }
 0x7ab   : > { %v1301_v38 = vadd.f32 %v1298_v37, %v1202_v0 }
 0x7ad   : > { %v1307_v39 = vsel %vm864_vm8, %v1301_v38, 0.0 }
 0x7ae   : > { %1308 = vadd.xlane.f32.xlu1 %v1307_v39 }
 0x819   : > { %v1306_v40 = vpop.xlane.xlu2 %1305 }
 0x81a   : > { %v1310_v41 = vmul.f32 %v1306_v40, %v2297_v53 }
 0x81c   : > { %v1312_v42 = vsub.f32 %v1300_v34, %v1310_v41 }
 0x81e   : > { %v1314_v43 = vmul.f32 %v1312_v42, %v1312_v42 }
 0x820   : > { %v1316_v44 = vsel %vm864_vm8, %v1314_v43, 0.0 }
 0x821   : > { %1317 = vadd.xlane.f32.xlu0 %v1316_v44  ;;  %v1309_v45 = vpop.xlane.xlu1 %1308 }
 0x822   : > { %v1311_v46 = vmul.f32 %v1309_v45, %v2297_v53 }
 0x824   : > { %v1313_v47 = vsub.f32 %v1301_v38, %v1311_v46 }
 0x826   : > { %v1315_v48 = vmul.f32 %v1313_v47, %v1313_v47 }
 0x828   : > { %v1319_v49 = vsel %vm864_vm8, %v1315_v48, 0.0 }
 0x829   : > { %1320 = vadd.xlane.f32.xlu2 %v1319_v49 }
 0x894   : > { %v1318_v50 = vpop.xlane.xlu0 %1317 }
 0x895   : > { %v1322_v51 = vmul.f32 %v1318_v50, %v2297_v53 }
 0x897   : > { %v1324_v52 = vadd.f32 1e-05, %v1322_v51 }
 0x899   : > { %1790 = vrsqrt.f32 %v1324_v52  ;;  %vm1332_vm3 = vweird.f32 %v1324_v52 }
 0x89c   : > { %v1321_v55 = vpop.xlane.xlu2 %1320 }
 0x89d   : > { %v1323_v56 = vmul.f32 %v1321_v55, %v2297_v53 }
 0x89f   : > { %v1791_v57 = vpop.eup %1790  ;;  %v1325_v58 = vadd.f32 1e-05, %v1323_v56 }
 0x8a0   : > { %v1327_v59 = vmul.f32 %v1791_v57, %v1324_v52  ;;  %vm1333_vm2 = vweird.f32 %v1791_v57 }
 0x8a1   : > { %1792 = vrsqrt.f32 %v1325_v58  ;;  %vm1334_vm4 = vmor %vm1332_vm3, %vm1333_vm2  ;;  %vm1342_vm6 = vweird.f32 %v1325_v58 }
 0x8a2   : > { %v1328_v60 = vmul.f32 %v1791_v57, %v1327_v59 }
 0x8a4   : > { %v1329_v61 = vmul.f32 0.5, %v1328_v60 }
 0x8a6   : > { %v1330_v62 = vsub.f32 1.5, %v1329_v61 }
 0x8a7   : > { %v1793_v63 = vpop.eup %1792 }
 0x8a8   : > { %v1331_v0 = vmul.f32 %v1791_v57, %v1330_v62  ;;  %v1337_v1 = vmul.f32 %v1793_v63, %v1325_v58  ;;  %vm1343_vm5 = vweird.f32 %v1793_v63 }
 0x8a9   : > { %vm1344_vm7 = vmor %vm1342_vm6, %vm1343_vm5 }
 0x8aa   : > { %v1335_v53 = vsel %vm1334_vm4, %v1791_v57, %v1331_v0  ;;  %v1338_v3 = vmul.f32 %v1793_v63, %v1337_v1 }
 0x8ab   : > { %v1346_v5 = vmul.f32 %v1335_v53, %v1312_v42 }
 0x8ac   : > { %v1339_v6 = vmul.f32 0.5, %v1338_v3 }
 0x8ad   : > { %v1351_v7 = vmul.f32 %v1762_v2, %v1346_v5 }
 0x8ae   : > { %v1340_v8 = vsub.f32 1.5, %v1339_v6 }
 0x8af   : > { %v1356_v9 = vadd.f32 %v1763_v4, %v1351_v7 }
 0x8b0   : > { %v1341_v10 = vmul.f32 %v1793_v63, %v1340_v8 }
 0x8b1   : > { %1358 = vst.msk [vmem:[#allocation2] sm:$0xff] %vm864_vm8, %v1356_v9 }
 0x8b2   : > { %v1345_v11 = vsel %vm1344_vm7, %v1793_v63, %v1341_v10 }
 0x8b3   : > { %v1347_v12 = vmul.f32 %v1345_v11, %v1313_v47 }
 0x8b5   : > { %v1352_v13 = vmul.f32 %v1762_v2, %v1347_v12  ;;  %1363 = sbr.rel (%p1650_p1) target bundleno = 2497 (0x9c1), region = 112 }
 0x8b7   : > { %v1357_v14 = vadd.f32 %v1763_v4, %v1352_v13 }
 0x8b9   : > { %1359 = vst.msk [vmem:[#allocation2 + $0x8] sm:$0xff] %vm864_vm8, %v1357_v14 }
 0x8ba   : > { %1389 = vmatpush.msra.mxu0 %v1357_v14  ;;  %v1364_v15 = vlaneseq  ;;  %v1398_v16 = vld [vmem:[%s2443_s23 + $0x18] sm:$0xff]  ;;  %v1397_v17 = vld [vmem:[%s2443_s23 + $0x10] sm:$0xff]  ;;  %v1396_v20 = vld [vmem:[%s2443_s23 + $0x8] sm:$0xff]  ;;  %v1971_v22 = vmov 0.0   ;;  %vm1426_vm11 = vcmask 58368  }
 0x8bb   : > { %1418 = vmatpush.msra.mxu1 %v1398_v16  ;;  %v1395_v54 = vld [vmem:[%s2443_s23] sm:$0xff] }
 0x8bc   : > { %1390 = vmatpush.msra.mxu0 %v1356_v9  ;;  %v1365_v18 = vand.u32 127, %v1364_v15  ;;  %v1367_v19 = vshrl.u32 %v1364_v15, 7  ;;  %v1794_v25 = vld [vmem:[%s2444_s1] ss:$0 sm:$0xff] }
 0x8bd   : > { %1419 = vmatpush.msra.mxu1 %v1397_v17 }
 0x8be   : > { %v1368_v21 = vmul.u32 8, %v1367_v19 }
 0x8bf   : > { %1420 = vmatpush.msra.mxu1 %v1396_v20 }
 0x8c0   : > { %vm1369_vm10 = vcmp.eq.s32.totalorder %v1365_v18, %v1368_v21 }
 0x8c1   : > { %v1651_v23 = vsel %vm1369_vm10, 1.0, %v1971_v22  ;;  %1421 = vmatpush.msra.mxu1 %v1395_v54 }
 0x8c2   : > { %1652 = vmatmul.msk.f32.vlgmr.msra.gmra.mxu0 %vm904_vm9, %v1651_v23 }
 0x93f   : > { %v1392_v24 = vpop.f32.mrf.mxu0 }
 0x940   : > { %1653 = vmatmul.msk.f32.vlgmr.msra.gmra.mxu1 %vm864_vm8, %v1392_v24 }
 0x9bd   : > { %v1423_v26 = vpop.f32.mrf.mxu1 }
 0x9be   : > { %v1424_v27 = vadd.f32 %v1794_v25, %v1423_v26 }
 0x9c0   : > { %1427 = vst.msk [vmem:[#allocation9] sm:$0x3] %vm1426_vm11, %v1424_v27 }
 0x9c1 PF: > { %p1692_p4 = scmp.eq.s32.totalorder %s2087_s0, 1  ;;  %s1972_s28 = smov [#allocation9]  }
 0x9c2   : > { %s1434_s29 = sshll.u32 %s1972_s28, 4  ;;  %s2445_s24 = sld [smem:[#allocation27_spill]]  ;;  %s1435_s29 = int_to_ptr.vmem [resolvable:$true] %s1434_s29 }
 0x9c8   : > { %s1436_s20 = sshll.u32 %s2445_s24, 4  ;;  %s1437_s20 = int_to_ptr.hbm [resolvable:$true] %s1436_s20 }
 0x9c9   : > { %1673 = dma.vmem_to_hbm [thread:$0]  (%p1692_p4), %s1435_s29, 32, %s1437_s20, [#allocation5]  }
 0x9ca   : > { %1942 = dma.done.wait (%p1692_p4), [#allocation5], 32  }
 0x9cb   : > { %1944 = vsyncadd (%p1692_p4), [#allocation5], 4294967264 }
 0x9cc PF: > { %s2446_s30 = sld [smem:[#allocation16_spill]] }
 0x9cd   : > { %s2447_s27 = sld [smem:[#allocation14_spill]] }
 0x9ce   : > { %s2448_s28 = sld [smem:[#allocation15_spill]] }
 0x9cf   : > { %s2449_s29 = sld [smem:[#allocation17_spill]] }
 0x9d2   : > { %p28_p5 = scmp.ge.s32.totalorder %s2446_s30, 4  }
 0x9d4   :  { %30 = sbr.rel (!%p28_p5) target bundleno = 15 (0xf), region = 177 }
 0x9d9   :  { %1450 = vsyncpa [#allocation4], 1 }
 0x9da   :  { %1452 = vsyncpa [#allocation4 + $0x1], 1 }
 0x9db   :  { %1453 = vsyncpa [#allocation7], 1 }
 0x9dc   :  { %1454 = vsyncpa [#allocation5], 1 }
 0x9dd   :  { %1456 = vsyncpa [#allocation5 + $0x1], 1 }

</bundles_post_ra>
